<compile_context>
chip_gen: v7x
topology: tpu7x:2x2x1
jax: 0.10.0
libtpu: 0.0.40
codegen_flags: <defaults>
</compile_context>

<pallas_src>
import jax
import jax.numpy as jnp
from jax import lax
from jax.experimental import pallas as pl
from jax.experimental.pallas import tpu as pltpu


def fasternet_block_kernel(x_ref, xp_ref, w3w1_ref, w1z_ref, s_ref, b_ref,
                           w2_ref, o_ref):
    """One image per grid step.

    x_ref    : (1, HW, C)         f32   original input (residual + passthrough)
    xp_ref   : (1, H+2, W+2, Cp)  bf16  zero-padded first-Cp channels
    w3w1_ref : (9, Cp, Hd)        bf16  per-tap fused weight  w3[k] @ w1[:Cp]
    w1z_ref  : (C, Hd)            bf16  w1 with first Cp rows zeroed
    s_ref    : (1, Hd)            f32   folded BatchNorm scale
    b_ref    : (1, Hd)            f32   folded BatchNorm bias
    w2_ref   : (Hd, C)            bf16  second 1x1 conv weight (in, out)
    o_ref    : (1, HW, C)         f32   output (aliased with x)
    """
    H = xp_ref.shape[1] - 2
    W = xp_ref.shape[2] - 2
    cp = xp_ref.shape[3]
    HW = H * W

    x = x_ref[0]                                            # (HW, C) f32

    # Passthrough channels through the first 1x1 (rows :Cp of w1z are zero,
    # so the conv channels contribute only via the fused tap weights below).
    h = jnp.dot(x.astype(jnp.bfloat16), w1z_ref[...],
                preferred_element_type=jnp.float32)         # (HW, Hd) f32

    # 3x3 partial conv folded into the first 1x1: nine shifted taps built from
    # the VMEM-resident padded slab; each tap is a (HW, Cp)x(Cp, Hd) matmul
    # accumulated in f32.
    xp = xp_ref[0]                                          # (H+2, W+2, Cp) bf16
    for k in range(9):
        ky, kx = divmod(k, 3)
        tap = xp[ky:ky + H, kx:kx + W, :].reshape(HW, cp)
        h = h + jnp.dot(tap, w3w1_ref[k],
                        preferred_element_type=jnp.float32)

    # Folded BN + ReLU + second 1x1 + residual.
    h = jnp.maximum(h * s_ref[...] + b_ref[...], 0.0)
    y = jnp.dot(h.astype(jnp.bfloat16), w2_ref[...],
                preferred_element_type=jnp.float32)         # (HW, C) f32
    o_ref[0] = x + y


def fasternet_block(x_nhwc, w3_hwio, w1, bn_scale, bn_bias, w2, n_div):
    """x_nhwc: (N, H, W, C) float32.  Returns (N, H, W, C) float32."""
    N, H, W, C = x_nhwc.shape
    Cp = C // n_div
    Hd = w1.shape[1]
    HW = H * W

    # Residual / passthrough operand (full channels, f32).
    x_flat = x_nhwc.reshape(N, HW, C)

    # Zero-padded first-Cp-channel slab (bf16); the nine conv taps are built
    # inside the kernel, so no im2col array ever touches HBM.
    xp = jnp.pad(x_nhwc[..., :Cp],
                 ((0, 0), (1, 1), (1, 1), (0, 0))).astype(jnp.bfloat16)

    # Fold the 3x3 partial-conv weight into the first 1x1:  (9, Cp, Hd).
    w3w1 = jnp.einsum("yxio,od->yxid", w3_hwio, w1[:Cp]) \
              .reshape(9, Cp, Hd).astype(jnp.bfloat16)
    # Zero the first Cp rows of w1 so the kernel can do a full-width x @ w1z
    # (avoids an in-kernel lane slice at a non-128 boundary).
    w1z = w1.at[:Cp].set(0.0).astype(jnp.bfloat16)

    scale2d = bn_scale.reshape(1, Hd).astype(jnp.float32)
    bias2d = bn_bias.reshape(1, Hd).astype(jnp.float32)
    w2b = w2.astype(jnp.bfloat16)

    out = pl.pallas_call(
        fasternet_block_kernel,
        out_shape=jax.ShapeDtypeStruct((N, HW, C), jnp.float32),
        grid_spec=pltpu.PrefetchScalarGridSpec(
            num_scalar_prefetch=0,
            grid=(N,),
            in_specs=[
                pl.BlockSpec((1, HW, C), lambda n: (n, 0, 0)),
                pl.BlockSpec((1, H + 2, W + 2, Cp), lambda n: (n, 0, 0, 0)),
                pl.BlockSpec((9, Cp, Hd), lambda n: (0, 0, 0)),
                pl.BlockSpec((C, Hd), lambda n: (0, 0)),
                pl.BlockSpec((1, Hd), lambda n: (0, 0)),
                pl.BlockSpec((1, Hd), lambda n: (0, 0)),
                pl.BlockSpec((Hd, C), lambda n: (0, 0)),
            ],
            out_specs=pl.BlockSpec((1, HW, C), lambda n: (n, 0, 0)),
        ),
        input_output_aliases={0: 0},
        compiler_params=pltpu.CompilerParams(
            dimension_semantics=("parallel",),
            vmem_limit_bytes=32 * 1024 * 1024),
    )(x_flat, xp, w3w1, w1z, scale2d, bias2d, w2b)

    return out.reshape(N, H, W, C)


def reference(x_nhwc, w3_hwio, w1, bn_scale, bn_bias, w2, n_div):
    """Pure-JAX f32 reference (NHWC) of the same forward pass."""
    C = x_nhwc.shape[-1]
    Cp = C // n_div
    conv = lax.conv_general_dilated(
        x_nhwc[..., :Cp], w3_hwio, window_strides=(1, 1), padding="SAME",
        dimension_numbers=("NHWC", "HWIO", "NHWC"))
    mixed = jnp.concatenate([conv, x_nhwc[..., Cp:]], axis=-1)
    h = jnp.einsum("nhwc,cd->nhwd", mixed, w1)
    h = jnp.maximum(h * bn_scale + bn_bias, 0.0)
    y = jnp.einsum("nhwd,dc->nhwc", h, w2)
    return x_nhwc + y


if __name__ == "__main__":
    # Module hyper-params: dim=64, n_div=4, mlp_ratio=2.0, drop_path=0.0,
    # layer_scale_init_value=0.0, act_layer=ReLU, norm_layer=BatchNorm2d,
    # pconv_fw_type='split_cat'.
    N, H, W = 2, 16, 16
    dim, n_div, mlp_ratio = 64, 4, 2.0
    Cp = dim // n_div
    Hd = int(dim * mlp_ratio)

    key = jax.random.PRNGKey(0)
    k_x, k_w3, k_w1, k_w2, k_g, k_b, k_m, k_v = jax.random.split(key, 8)

    # Input (PyTorch module takes NCHW; we generate NHWC directly — layout choice).
    x = jax.random.normal(k_x, (N, H, W, dim), dtype=jnp.float32)

    # PartialConv 3x3 weight, HWIO layout (= PyTorch (Cp, Cp, 3, 3) transposed).
    w3 = jax.random.normal(k_w3, (3, 3, Cp, Cp), dtype=jnp.float32) * 0.1
    # 1x1 convs as (in, out) matrices (= PyTorch (out, in, 1, 1) transposed).
    w1 = jax.random.normal(k_w1, (dim, Hd), dtype=jnp.float32) * 0.1
    w2 = jax.random.normal(k_w2, (Hd, dim), dtype=jnp.float32) * 0.1

    # BatchNorm2d (eval mode) folded into scale/bias.
    gamma = 1.0 + 0.1 * jax.random.normal(k_g, (Hd,), dtype=jnp.float32)
    beta = 0.1 * jax.random.normal(k_b, (Hd,), dtype=jnp.float32)
    rmean = 0.1 * jax.random.normal(k_m, (Hd,), dtype=jnp.float32)
    rvar = 1.0 + 0.1 * jax.random.uniform(k_v, (Hd,), dtype=jnp.float32)
    eps = 1e-5
    bn_scale = gamma / jnp.sqrt(rvar + eps)
    bn_bias = beta - rmean * bn_scale

    # f32 reference first (kernel output buffer is aliased with its input).
    ref = reference(x, w3, w1, bn_scale, bn_bias, w2, n_div)
    ref = jax.block_until_ready(ref)

    run = jax.jit(fasternet_block, static_argnums=6)
    out = run(x, w3, w1, bn_scale, bn_bias, w2, n_div)
    out = jax.block_until_ready(out)

    # bf16 matmul operands (f32 accumulation) + folded weights -> widened tol.
    if not jnp.allclose(out, ref, rtol=5e-2, atol=5e-2):
        raise AssertionError("Pallas kernel does not match JAX reference")

    print("KERNEL_OK")
</pallas_src>

<mosaic_0001>
module attributes {stable_mosaic.version = 11 : i64} {
  func.func @fasternet_block_kernel(%arg0: i32, %arg1: memref<1x256x64xf32, #tpu.memory_space<vmem>>, %arg2: memref<1x18x18x16xbf16, #tpu.memory_space<vmem>>, %arg3: memref<9x16x128xbf16, #tpu.memory_space<vmem>>, %arg4: memref<64x128xbf16, #tpu.memory_space<vmem>>, %arg5: memref<1x128xf32, #tpu.memory_space<vmem>>, %arg6: memref<1x128xf32, #tpu.memory_space<vmem>>, %arg7: memref<128x64xbf16, #tpu.memory_space<vmem>>, %arg8: memref<1x256x64xf32, #tpu.memory_space<vmem>>) attributes {dimension_semantics = [#tpu.dimension_semantics<parallel>], iteration_bounds = array<i64: 2>, scalar_prefetch = 0 : i64, scratch_operands = 0 : i64, tpu.core_type = #tpu.core_type<tc>, window_params = [{transform_indices = @transform_0, window_bounds = array<i64: 1, 256, 64>}, {transform_indices = @transform_1, window_bounds = array<i64: 1, 18, 18, 16>}, {pipeline_mode = #tpu.pipeline_mode<synchronous>, transform_indices = @transform_2, window_bounds = array<i64: 9, 16, 128>}, {pipeline_mode = #tpu.pipeline_mode<synchronous>, transform_indices = @transform_3, window_bounds = array<i64: 64, 128>}, {pipeline_mode = #tpu.pipeline_mode<synchronous>, transform_indices = @transform_4, window_bounds = array<i64: 1, 128>}, {pipeline_mode = #tpu.pipeline_mode<synchronous>, transform_indices = @transform_5, window_bounds = array<i64: 1, 128>}, {pipeline_mode = #tpu.pipeline_mode<synchronous>, transform_indices = @transform_6, window_bounds = array<i64: 128, 64>}, {transform_indices = @transform_7, window_bounds = array<i64: 1, 256, 64>}]} {
    %c0 = arith.constant 0 : index
    %c0_0 = arith.constant 0 : index
    %c0_1 = arith.constant 0 : index
    %0 = vector.load %arg1[%c0, %c0_0, %c0_1] : memref<1x256x64xf32, #tpu.memory_space<vmem>>, vector<1x256x64xf32>
    %1 = vector.shape_cast %0 : vector<1x256x64xf32> to vector<256x64xf32>
    %2 = arith.truncf %1 : vector<256x64xf32> to vector<256x64xbf16>
    %c0_2 = arith.constant 0 : index
    %c0_3 = arith.constant 0 : index
    %3 = vector.load %arg4[%c0_2, %c0_3] : memref<64x128xbf16, #tpu.memory_space<vmem>>, vector<64x128xbf16>
    %cst = arith.constant dense<0.000000e+00> : vector<256x128xf32>
    %4 = tpu.matmul %2, %3, %cst {dimension_numbers = #tpu.dot_dimension_numbers<[1], [0], [0], [1], [0, 0, 1, 1], [], []>} : vector<256x64xbf16>, vector<64x128xbf16>, vector<256x128xf32> -> vector<256x128xf32>
    %c0_4 = arith.constant 0 : index
    %c0_5 = arith.constant 0 : index
    %c0_6 = arith.constant 0 : index
    %c0_7 = arith.constant 0 : index
    %5 = vector.load %arg2[%c0_4, %c0_5, %c0_6, %c0_7] : memref<1x18x18x16xbf16, #tpu.memory_space<vmem>>, vector<1x18x18x16xbf16>
    %6 = vector.shape_cast %5 : vector<1x18x18x16xbf16> to vector<18x18x16xbf16>
    %7 = vector.extract_strided_slice %6 {offsets = [0, 0, 0], sizes = [16, 16, 16], strides = [1, 1, 1]} : vector<18x18x16xbf16> to vector<16x16x16xbf16>
    %8 = vector.shape_cast %7 : vector<16x16x16xbf16> to vector<256x16xbf16>
    %c0_8 = arith.constant 0 : index
    %c0_9 = arith.constant 0 : index
    %c0_10 = arith.constant 0 : index
    %9 = vector.load %arg3[%c0_8, %c0_9, %c0_10] : memref<9x16x128xbf16, #tpu.memory_space<vmem>>, vector<1x16x128xbf16>
    %10 = vector.shape_cast %9 : vector<1x16x128xbf16> to vector<16x128xbf16>
    %cst_11 = arith.constant dense<0.000000e+00> : vector<256x128xf32>
    %11 = tpu.matmul %8, %10, %cst_11 {dimension_numbers = #tpu.dot_dimension_numbers<[1], [0], [0], [1], [0, 0, 1, 1], [], []>} : vector<256x16xbf16>, vector<16x128xbf16>, vector<256x128xf32> -> vector<256x128xf32>
    %12 = arith.addf %4, %11 : vector<256x128xf32>
    %13 = vector.extract_strided_slice %6 {offsets = [0, 1, 0], sizes = [16, 16, 16], strides = [1, 1, 1]} : vector<18x18x16xbf16> to vector<16x16x16xbf16>
    %14 = vector.shape_cast %13 : vector<16x16x16xbf16> to vector<256x16xbf16>
    %c1 = arith.constant 1 : index
    %c0_12 = arith.constant 0 : index
    %c0_13 = arith.constant 0 : index
    %15 = vector.load %arg3[%c1, %c0_12, %c0_13] : memref<9x16x128xbf16, #tpu.memory_space<vmem>>, vector<1x16x128xbf16>
    %16 = vector.shape_cast %15 : vector<1x16x128xbf16> to vector<16x128xbf16>
    %cst_14 = arith.constant dense<0.000000e+00> : vector<256x128xf32>
    %17 = tpu.matmul %14, %16, %cst_14 {dimension_numbers = #tpu.dot_dimension_numbers<[1], [0], [0], [1], [0, 0, 1, 1], [], []>} : vector<256x16xbf16>, vector<16x128xbf16>, vector<256x128xf32> -> vector<256x128xf32>
    %18 = arith.addf %12, %17 : vector<256x128xf32>
    %19 = vector.extract_strided_slice %6 {offsets = [0, 2, 0], sizes = [16, 16, 16], strides = [1, 1, 1]} : vector<18x18x16xbf16> to vector<16x16x16xbf16>
    %20 = vector.shape_cast %19 : vector<16x16x16xbf16> to vector<256x16xbf16>
    %c2 = arith.constant 2 : index
    %c0_15 = arith.constant 0 : index
    %c0_16 = arith.constant 0 : index
    %21 = vector.load %arg3[%c2, %c0_15, %c0_16] : memref<9x16x128xbf16, #tpu.memory_space<vmem>>, vector<1x16x128xbf16>
    %22 = vector.shape_cast %21 : vector<1x16x128xbf16> to vector<16x128xbf16>
    %cst_17 = arith.constant dense<0.000000e+00> : vector<256x128xf32>
    %23 = tpu.matmul %20, %22, %cst_17 {dimension_numbers = #tpu.dot_dimension_numbers<[1], [0], [0], [1], [0, 0, 1, 1], [], []>} : vector<256x16xbf16>, vector<16x128xbf16>, vector<256x128xf32> -> vector<256x128xf32>
    %24 = arith.addf %18, %23 : vector<256x128xf32>
    %25 = vector.extract_strided_slice %6 {offsets = [1, 0, 0], sizes = [16, 16, 16], strides = [1, 1, 1]} : vector<18x18x16xbf16> to vector<16x16x16xbf16>
    %26 = vector.shape_cast %25 : vector<16x16x16xbf16> to vector<256x16xbf16>
    %c3 = arith.constant 3 : index
    %c0_18 = arith.constant 0 : index
    %c0_19 = arith.constant 0 : index
    %27 = vector.load %arg3[%c3, %c0_18, %c0_19] : memref<9x16x128xbf16, #tpu.memory_space<vmem>>, vector<1x16x128xbf16>
    %28 = vector.shape_cast %27 : vector<1x16x128xbf16> to vector<16x128xbf16>
    %cst_20 = arith.constant dense<0.000000e+00> : vector<256x128xf32>
    %29 = tpu.matmul %26, %28, %cst_20 {dimension_numbers = #tpu.dot_dimension_numbers<[1], [0], [0], [1], [0, 0, 1, 1], [], []>} : vector<256x16xbf16>, vector<16x128xbf16>, vector<256x128xf32> -> vector<256x128xf32>
    %30 = arith.addf %24, %29 : vector<256x128xf32>
    %31 = vector.extract_strided_slice %6 {offsets = [1, 1, 0], sizes = [16, 16, 16], strides = [1, 1, 1]} : vector<18x18x16xbf16> to vector<16x16x16xbf16>
    %32 = vector.shape_cast %31 : vector<16x16x16xbf16> to vector<256x16xbf16>
    %c4 = arith.constant 4 : index
    %c0_21 = arith.constant 0 : index
    %c0_22 = arith.constant 0 : index
    %33 = vector.load %arg3[%c4, %c0_21, %c0_22] : memref<9x16x128xbf16, #tpu.memory_space<vmem>>, vector<1x16x128xbf16>
    %34 = vector.shape_cast %33 : vector<1x16x128xbf16> to vector<16x128xbf16>
    %cst_23 = arith.constant dense<0.000000e+00> : vector<256x128xf32>
    %35 = tpu.matmul %32, %34, %cst_23 {dimension_numbers = #tpu.dot_dimension_numbers<[1], [0], [0], [1], [0, 0, 1, 1], [], []>} : vector<256x16xbf16>, vector<16x128xbf16>, vector<256x128xf32> -> vector<256x128xf32>
    %36 = arith.addf %30, %35 : vector<256x128xf32>
    %37 = vector.extract_strided_slice %6 {offsets = [1, 2, 0], sizes = [16, 16, 16], strides = [1, 1, 1]} : vector<18x18x16xbf16> to vector<16x16x16xbf16>
    %38 = vector.shape_cast %37 : vector<16x16x16xbf16> to vector<256x16xbf16>
    %c5 = arith.constant 5 : index
    %c0_24 = arith.constant 0 : index
    %c0_25 = arith.constant 0 : index
    %39 = vector.load %arg3[%c5, %c0_24, %c0_25] : memref<9x16x128xbf16, #tpu.memory_space<vmem>>, vector<1x16x128xbf16>
    %40 = vector.shape_cast %39 : vector<1x16x128xbf16> to vector<16x128xbf16>
    %cst_26 = arith.constant dense<0.000000e+00> : vector<256x128xf32>
    %41 = tpu.matmul %38, %40, %cst_26 {dimension_numbers = #tpu.dot_dimension_numbers<[1], [0], [0], [1], [0, 0, 1, 1], [], []>} : vector<256x16xbf16>, vector<16x128xbf16>, vector<256x128xf32> -> vector<256x128xf32>
    %42 = arith.addf %36, %41 : vector<256x128xf32>
    %43 = vector.extract_strided_slice %6 {offsets = [2, 0, 0], sizes = [16, 16, 16], strides = [1, 1, 1]} : vector<18x18x16xbf16> to vector<16x16x16xbf16>
    %44 = vector.shape_cast %43 : vector<16x16x16xbf16> to vector<256x16xbf16>
    %c6 = arith.constant 6 : index
    %c0_27 = arith.constant 0 : index
    %c0_28 = arith.constant 0 : index
    %45 = vector.load %arg3[%c6, %c0_27, %c0_28] : memref<9x16x128xbf16, #tpu.memory_space<vmem>>, vector<1x16x128xbf16>
    %46 = vector.shape_cast %45 : vector<1x16x128xbf16> to vector<16x128xbf16>
    %cst_29 = arith.constant dense<0.000000e+00> : vector<256x128xf32>
    %47 = tpu.matmul %44, %46, %cst_29 {dimension_numbers = #tpu.dot_dimension_numbers<[1], [0], [0], [1], [0, 0, 1, 1], [], []>} : vector<256x16xbf16>, vector<16x128xbf16>, vector<256x128xf32> -> vector<256x128xf32>
    %48 = arith.addf %42, %47 : vector<256x128xf32>
    %49 = vector.extract_strided_slice %6 {offsets = [2, 1, 0], sizes = [16, 16, 16], strides = [1, 1, 1]} : vector<18x18x16xbf16> to vector<16x16x16xbf16>
    %50 = vector.shape_cast %49 : vector<16x16x16xbf16> to vector<256x16xbf16>
    %c7 = arith.constant 7 : index
    %c0_30 = arith.constant 0 : index
    %c0_31 = arith.constant 0 : index
    %51 = vector.load %arg3[%c7, %c0_30, %c0_31] : memref<9x16x128xbf16, #tpu.memory_space<vmem>>, vector<1x16x128xbf16>
    %52 = vector.shape_cast %51 : vector<1x16x128xbf16> to vector<16x128xbf16>
    %cst_32 = arith.constant dense<0.000000e+00> : vector<256x128xf32>
    %53 = tpu.matmul %50, %52, %cst_32 {dimension_numbers = #tpu.dot_dimension_numbers<[1], [0], [0], [1], [0, 0, 1, 1], [], []>} : vector<256x16xbf16>, vector<16x128xbf16>, vector<256x128xf32> -> vector<256x128xf32>
    %54 = arith.addf %48, %53 : vector<256x128xf32>
    %55 = vector.extract_strided_slice %6 {offsets = [2, 2, 0], sizes = [16, 16, 16], strides = [1, 1, 1]} : vector<18x18x16xbf16> to vector<16x16x16xbf16>
    %56 = vector.shape_cast %55 : vector<16x16x16xbf16> to vector<256x16xbf16>
    %c8 = arith.constant 8 : index
    %c0_33 = arith.constant 0 : index
    %c0_34 = arith.constant 0 : index
    %57 = vector.load %arg3[%c8, %c0_33, %c0_34] : memref<9x16x128xbf16, #tpu.memory_space<vmem>>, vector<1x16x128xbf16>
    %58 = vector.shape_cast %57 : vector<1x16x128xbf16> to vector<16x128xbf16>
    %cst_35 = arith.constant dense<0.000000e+00> : vector<256x128xf32>
    %59 = tpu.matmul %56, %58, %cst_35 {dimension_numbers = #tpu.dot_dimension_numbers<[1], [0], [0], [1], [0, 0, 1, 1], [], []>} : vector<256x16xbf16>, vector<16x128xbf16>, vector<256x128xf32> -> vector<256x128xf32>
    %60 = arith.addf %54, %59 : vector<256x128xf32>
    %c0_36 = arith.constant 0 : index
    %c0_37 = arith.constant 0 : index
    %61 = vector.load %arg5[%c0_36, %c0_37] : memref<1x128xf32, #tpu.memory_space<vmem>>, vector<1x128xf32>
    %62 = vector.broadcast %61 : vector<1x128xf32> to vector<256x128xf32>
    %63 = arith.mulf %60, %62 : vector<256x128xf32>
    %c0_38 = arith.constant 0 : index
    %c0_39 = arith.constant 0 : index
    %64 = vector.load %arg6[%c0_38, %c0_39] : memref<1x128xf32, #tpu.memory_space<vmem>>, vector<1x128xf32>
    %65 = vector.broadcast %64 : vector<1x128xf32> to vector<256x128xf32>
    %66 = arith.addf %63, %65 : vector<256x128xf32>
    %cst_40 = arith.constant 0.000000e+00 : f32
    %67 = vector.broadcast %cst_40 : f32 to vector<256x128xf32>
    %68 = arith.maximumf %66, %67 : vector<256x128xf32>
    %69 = arith.truncf %68 : vector<256x128xf32> to vector<256x128xbf16>
    %c0_41 = arith.constant 0 : index
    %c0_42 = arith.constant 0 : index
    %70 = vector.load %arg7[%c0_41, %c0_42] : memref<128x64xbf16, #tpu.memory_space<vmem>>, vector<128x64xbf16>
    %cst_43 = arith.constant dense<0.000000e+00> : vector<256x64xf32>
    %71 = tpu.matmul %69, %70, %cst_43 {dimension_numbers = #tpu.dot_dimension_numbers<[1], [0], [0], [1], [0, 0, 1, 1], [], []>} : vector<256x128xbf16>, vector<128x64xbf16>, vector<256x64xf32> -> vector<256x64xf32>
    %72 = arith.addf %1, %71 : vector<256x64xf32>
    %c0_44 = arith.constant 0 : index
    %c0_45 = arith.constant 0 : index
    %c0_46 = arith.constant 0 : index
    %73 = vector.load %arg8[%c0_44, %c0_45, %c0_46] : memref<1x256x64xf32, #tpu.memory_space<vmem>>, vector<1x256x64xf32>
    %74 = vector.shape_cast %73 : vector<1x256x64xf32> to vector<256x64xf32>
    %75 = vector.shape_cast %72 : vector<256x64xf32> to vector<1x256x64xf32>
    tpu.vector_store %arg8[%c0_44, %c0_45, %c0_46], %75 {strides = array<i32>} : memref<1x256x64xf32, #tpu.memory_space<vmem>>, vector<1x256x64xf32>,
    return
  }
  func.func @transform_0(%arg0: i32) -> (i32, i32, i32) {
    %c0_i32 = arith.constant 0 : i32
    %c0_i32_0 = arith.constant 0 : i32
    %c0_i32_1 = arith.constant 0 : i32
    return %arg0, %c0_i32, %c0_i32_0 : i32, i32, i32
  }
  func.func @transform_1(%arg0: i32) -> (i32, i32, i32, i32) {
    %c0_i32 = arith.constant 0 : i32
    %c0_i32_0 = arith.constant 0 : i32
    %c0_i32_1 = arith.constant 0 : i32
    %c0_i32_2 = arith.constant 0 : i32
    return %arg0, %c0_i32, %c0_i32_0, %c0_i32_1 : i32, i32, i32, i32
  }
  func.func @transform_2(%arg0: i32) -> (i32, i32, i32) {
    %c0_i32 = arith.constant 0 : i32
    %c0_i32_0 = arith.constant 0 : i32
    %c0_i32_1 = arith.constant 0 : i32
    %c0_i32_2 = arith.constant 0 : i32
    return %c0_i32, %c0_i32_0, %c0_i32_1 : i32, i32, i32
  }
  func.func @transform_3(%arg0: i32) -> (i32, i32) {
    %c0_i32 = arith.constant 0 : i32
    %c0_i32_0 = arith.constant 0 : i32
    %c0_i32_1 = arith.constant 0 : i32
    return %c0_i32, %c0_i32_0 : i32, i32
  }
  func.func @transform_4(%arg0: i32) -> (i32, i32) {
    %c0_i32 = arith.constant 0 : i32
    %c0_i32_0 = arith.constant 0 : i32
    %c0_i32_1 = arith.constant 0 : i32
    return %c0_i32, %c0_i32_0 : i32, i32
  }
  func.func @transform_5(%arg0: i32) -> (i32, i32) {
    %c0_i32 = arith.constant 0 : i32
    %c0_i32_0 = arith.constant 0 : i32
    %c0_i32_1 = arith.constant 0 : i32
    return %c0_i32, %c0_i32_0 : i32, i32
  }
  func.func @transform_6(%arg0: i32) -> (i32, i32) {
    %c0_i32 = arith.constant 0 : i32
    %c0_i32_0 = arith.constant 0 : i32
    %c0_i32_1 = arith.constant 0 : i32
    return %c0_i32, %c0_i32_0 : i32, i32
  }
  func.func @transform_7(%arg0: i32) -> (i32, i32, i32) {
    %c0_i32 = arith.constant 0 : i32
    %c0_i32_0 = arith.constant 0 : i32
    %c0_i32_1 = arith.constant 0 : i32
    return %arg0, %c0_i32, %c0_i32_0 : i32, i32, i32
  }
}

</mosaic_0001>

<bundles_post_ra>
// kernel: fasternet_block.1
= control target key start
LH: loop header
LB: loop body
LE: loop exit
PB: predicated region body
PF: predicated region fallthrough
CT: control target
= control target key end

     0   :  { %s5122_s24 = smov 0   ;;  %s6640_s0 = inlined_call_operand.vmem [shape: f32[2,256,64], index: 0, kind: input, shape index: {}, may-alias: {0,7}]   ;;  %s6641_s1 = inlined_call_operand.vmem [shape: bf16[2,18,18,16], index: 1, kind: input, shape index: {}]   ;;  %s6642_s2 = inlined_call_operand.vmem [shape: bf16[9,16,128], index: 2, kind: input, shape index: {}]   ;;  %s6643_s3 = inlined_call_operand.vmem [shape: bf16[64,128], index: 3, kind: input, shape index: {}]   ;;  %s6644_s4 = inlined_call_operand.vmem [shape: f32[1,128], index: 4, kind: input, shape index: {}]   ;;  %s6645_s5 = inlined_call_operand.vmem [shape: f32[1,128], index: 5, kind: input, shape index: {}]   ;;  %s6646_s6 = inlined_call_operand.vmem [shape: bf16[128,64], index: 6, kind: input, shape index: {}]   ;;  %s6647_s7 = inlined_call_operand.vmem [shape: f32[2,256,64], index: 7, kind: output, shape index: {}, may-alias: {0,7}]  }
   0x1 LB: > { %s3854_s25 = sadd.s32 4294967295, %s5080_s24   ;;  %p3858_p0 = scmp.ge.s32.totalorder %s5080_s24, 1  ;;  %s5080_s24 = sphi %s5122_s24, %s17_s24  }
   0x2   : > { %p247_p1 = scmp.lt.s32.totalorder %s5080_s24, 3 }
   0x4   : > { %p248_p2 = pnand %p3858_p0, %p247_p1 }
   0x6   : > { %251 = sbr.rel (%p248_p2) target bundleno = 815 (0x32f), region = 48 }
   0xd   : > { %v5029_v0 = vld [vmem:[%s6642_s2 + $0x18] sm:$0xff]   ;;  %p284_p3 = scmp.lt.s32.totalorder %s3854_s25, 1  ;;  %v5030_v1 = vld [vmem:[%s6642_s2] sm:$0xff]   ;;  %vm498_vm0 = vcmask 130048   ;;  %v5048_v10 = vld [vmem:[%s6643_s3 + $0x8] sm:$0xff]   ;;  %vm732_vm4 = vcmask 523264  }
   0xe   : > { %4478 = vmatprep.subr.bf16.mxu0 %v5029_v0  ;;  %v5033_v2 = vld [vmem:[%s6642_s2 + $0x20] sm:$0xff]   ;;  %4336 = vmatprep.subr.bf16.mxu1 %v5030_v1  ;;  %v5195_v26 = vld [vmem:[%s6642_s2 + $0x28] sm:$0xff]   ;;  %v5051_v27 = vld [vmem:[%s6643_s3 + $0x10] sm:$0xff]   ;;  %vm942_vm1 = vsmask.f32 3328  ;;  %vm1643_vm5 = vcmask 1042432  }
   0xf   : > { %s6901_s25 = smov (!%p284_p3, %s3854_s25), 1  ;;  %4479 = vmatpush3.bf16.msra.mxu0 %v5029_v0  ;;  %4337 = vmatpush3.bf16.msra.mxu1 %v5030_v1  ;;  %v5047_v3 = vld [vmem:[%s6643_s3] sm:$0xff]   ;;  %vm943_vm2 = vsmask.f32 7440  ;;  %v5052_v37 = vld [vmem:[%s6643_s3 + $0x18] sm:$0xff]   ;;  %vm1644_vm6 = vcmask 1046532  }
  0x10   : > { %s5020_s9 = smul.u32 216, %s6901_s25  ;;  %4512 = vmatprep.subr.bf16.mxu0 %v5033_v2  ;;  %4370 = vmatprep.subr.bf16.mxu1 %v5047_v3  ;;  %vm5327_vm3 = vmor %vm942_vm1, %vm943_vm2  ;;  %s4137_s27 = sshll.u32 %s6901_s25, 8 }
  0x11   : > { %vm5792_vm7 = vmor %vm1643_vm5, %vm1644_vm6  ;;  %s6539_s21 = scalar_lea.vmem %s6647_s7, %s4137_s27 }
  0x12   : > { %s5148_s14 = scalar_lea.vmem %s6641_s1, %s5020_s9  ;;  %s5579_s9 = scalar_lea.vmem %s6640_s0, %s4137_s27 }
  0x13   : > { %v5151_v4 = vld [vmem:[%s5148_s14] sm:$0xf]  ;;  %v5154_v5 = vld [vmem:[%s5148_s14 + $0x4] sm:$0xf]  ;;  %v5157_v6 = vld [vmem:[%s5148_s14 + $0xc] sm:$0xf] }
  0x14   : > { %v3864_v7 = vcombine.low %v5151_v4, %v5154_v5  ;;  %v5162_v8 = vld [vmem:[%s5148_s14 + $0x10] sm:$0xf]  ;;  %v970_v11 = vshrl.u32 %v5157_v6, 16  ;;  %v973_v12 = vshll.u32 %v5157_v6, 16  ;;  %v5176_v14 = vld [vmem:[%s5148_s14 + $0x18] sm:$0xf] }
  0x15   : > { %v3865_v9 = vcombine.low %v5157_v6, %v5162_v8  ;;  %v979_v13 = vshll.u32 %v5162_v8, 16  ;;  %v5179_v15 = vld [vmem:[%s5148_s14 + $0x1c] sm:$0xf]  ;;  %v983_v17 = vshrl.u32 %v5162_v8, 16  ;;  %v946_v18 = vshrl.u32 %v5151_v4, 16 }
  0x16   : > { %4338 = vmatprep.mubr.msk.bf16.mxu1 %vm498_vm0, %v3864_v7  ;;  %v972_v16 = vrot.slane %v970_v11, 4  ;;  %v975_v20 = vrot.slane %v973_v12, 5  ;;  %v5189_v24 = vcombine.low %v5176_v14, %v5179_v15  ;;  %v994_v25 = vshrl.u32 %v5176_v14, 16  ;;  %v5203_v31 = vld [vmem:[%s5148_s14 + $0x24] sm:$0xf] }
  0x17   : > { %4480 = vmatprep.mubr.msk.bf16.mxu0 %vm498_vm0, %v3865_v9  ;;  %4339 = vmatmul.mubr.msk.bf16.vlgmr.msra.gmra.mrb[0].mxu1 %vm498_vm0, %v3865_v9  ;;  %v5184_v21 = vrot.slane %v979_v13, 5  ;;  %v985_v23 = vrot.slane %v983_v17, 4  ;;  %v6648_v29 = vrot.slane %v5162_v8, 5  ;;  %v997_v30 = vshll.u32 %v5176_v14, 16  ;;  %v5206_v32 = vld [vmem:[%s5148_s14 + $0x28] sm:$0xf] }
  0x18   : > { %4371 = vmatpush3.bf16.msra.mxu1 %v5047_v3  ;;  %6729 = vst [vmem:[#allocation2_spill] sm:$0xff] %v5189_v24  ;;  %v976_v28 = vor.u32 %v975_v20, %v972_v16  ;;  %v996_v34 = vrot.slane %v994_v25, 4  ;;  %v1003_v35 = vshll.u32 %v5179_v15, 16  ;;  %v1007_v36 = vshrl.u32 %v5179_v15, 16  ;;  %4481 = vmatmul.mubr.msk.bf16.vlgmr.msra.gmra.mrb[0].mxu0 %vm498_vm0, %v5189_v24  ;;  %v5222_v41 = vld [vmem:[%s5148_s14 + $0x30] sm:$0xf] }
  0x19   : > { %4372 = vmatprep.subr.bf16.mxu1 %v5048_v10  ;;  %4342 = vmatprep.mubr.msk.bf16.mxu1 %vm498_vm0, %v5189_v24  ;;  %v5218_v38 = vrot.slane %v946_v18, 4  ;;  %v986_v39 = vor.u32 %v985_v23, %v5184_v21  ;;  %v999_v40 = vrot.slane %v997_v30, 5  ;;  %v5225_v42 = vld [vmem:[%s5148_s14 + $0x34] sm:$0xf]  ;;  %v5231_v45 = vcombine.low %v5203_v31, %v5206_v32  ;;  %v5234_v46 = vld [vmem:[%s5148_s14 + $0x3c] sm:$0xf] }
  0x1a   : > { %4513 = vmatpush3.bf16.msra.mxu0 %v5033_v2  ;;  %v5227_v43 = vrot.slane %v1003_v35, 5  ;;  %v1009_v44 = vrot.slane %v1007_v36, 4  ;;  %v5237_v47 = vld [vmem:[%s5148_s14 + $0x40] sm:$0xf]  ;;  %v5240_v48 = vrot.slane %v976_v28, 4  ;;  %v5245_v50 = vrot.slane %v6648_v29, 4 }
  0x1b   : > { %6730 = vst [vmem:[#allocation3_spill] sm:$0xff] %v5231_v45  ;;  %4546 = vmatprep.subr.bf16.mxu0 %v5195_v26  ;;  %v1000_v51 = vor.u32 %v999_v40, %v996_v34  ;;  %4484 = vmatprep.mubr.msk.bf16.mxu0 %vm498_vm0, %v5231_v45  ;;  %v5256_v55 = vcombine.low %v5222_v41, %v5225_v42  ;;  %v5258_v56 = vrot.slane %v986_v39, 4  ;;  %v1018_v57 = vshrl.u32 %v5203_v31, 16  ;;  %v5266_v59 = vld [vmem:[%s5148_s14 + $0x48] sm:$0xf] }
  0x1c   : > { %4373 = vmatpush3.bf16.msra.mxu1 %v5048_v10  ;;  %v1010_v52 = vor.u32 %v1009_v44, %v5227_v43  ;;  %v5263_v58 = vcombine.low %v5234_v46, %v5237_v47  ;;  %6733 = vst [vmem:[#allocation6_spill] sm:$0xff] %v5266_v59  ;;  %v5269_v60 = vld [vmem:[%s5148_s14 + $0x4c] sm:$0xf]  ;;  %v1021_v61 = vshll.u32 %v5203_v31, 16  ;;  %v1031_v62 = vshrl.u32 %v5206_v32, 16 }
  0x1d   : > { %4374 = vmatprep.subr.bf16.mxu1 %v5051_v27  ;;  %6731 = vst [vmem:[#allocation4_spill] sm:$0xff] %v5256_v55  ;;  %6734 = vst [vmem:[#allocation7_spill] sm:$0xff] %v5269_v60  ;;  %v5276_v63 = vld [vmem:[%s5148_s14 + $0x54] sm:$0xf]  ;;  %v5279_v0 = vld [vmem:[%s5148_s14 + $0x58] sm:$0xf]  ;;  %v5306_v18 = vcombine.low %v5266_v59, %v5269_v60  ;;  %v982_v39 = vsel %vm5327_vm3, %v5240_v48, %v5184_v21 }
  0x1e   : > { %6732 = vst [vmem:[#allocation5_spill] sm:$0xff] %v5263_v58  ;;  %v5281_v1 = vrot.slane %v1000_v51, 4  ;;  %v1042_v2 = vshrl.u32 %v5222_v41, 16  ;;  %v5285_v3 = vld [vmem:[%s5148_s14 + $0x60] sm:$0xf]  ;;  %v5290_v9 = vrot.slane %v1010_v52, 4  ;;  %v5316_v28 = vcombine.low %v5276_v63, %v5279_v0 }
  0x1f   : > { %4343 = vmatmul.mubr.msk.bf16.gmra.mrb[4].mxu1 %vm498_vm0, %v5231_v45  ;;  %v5288_v7 = vld [vmem:[%s5148_s14 + $0x14] sm:$0x1]  ;;  %v1045_v10 = vshll.u32 %v5222_v41, 16  ;;  %v1055_v11 = vshrl.u32 %v5225_v42, 16  ;;  %v1066_v12 = vshrl.u32 %v5234_v46, 16  ;;  %6736 = vst [vmem:[#allocation9_spill] sm:$0xff] %v5306_v18 }
  0x20   : > { %4375 = vmatpush3.bf16.msra.mxu1 %v5051_v27  ;;  %4346 = vmatprep.mubr.msk.bf16.mxu1 %vm498_vm0, %v5256_v55  ;;  %v5298_v13 = vld [vmem:[%s5148_s14 + $0x64] sm:$0xf]  ;;  %v5310_v23 = vld [vmem:[%s5148_s14 + $0x20] sm:$0x1]  ;;  %6737 = vst [vmem:[#allocation10_spill] sm:$0xff] %v5316_v28  ;;  %v989_v30 = vshll.u32 %v5288_v7, 16  ;;  %v1006_v21 = vsel %vm5327_vm3, %v5281_v1, %v5227_v43 }
  0x21   : > { %4376 = vmatprep.subr.bf16.mxu1 %v5052_v37  ;;  %4485 = vmatmul.mubr.msk.bf16.gmra.mrb[4].mxu0 %vm498_vm0, %v5256_v55  ;;  %6735 = vst [vmem:[#allocation8_spill] sm:$0xff] %v5298_v13  ;;  %v5320_v34 = vld [vmem:[%s5148_s14 + $0x6c] sm:$0xf]  ;;  %v5332_v40 = vld [vmem:[%s5148_s14 + $0x70] sm:$0xf]  ;;  %v1013_v44 = vshll.u32 %v5310_v23, 16  ;;  %v5339_v51 = vcombine.low %v5285_v3, %v5298_v13 }
  0x22   : > { %4488 = vmatprep.mubr.msk.bf16.mxu0 %vm498_vm0, %v5263_v58  ;;  %6738 = vst [vmem:[#allocation11_spill] sm:$0xff] %v5320_v34  ;;  %6741 = vst [vmem:[#allocation12_spill] sm:$0xff] %v5332_v40  ;;  %v991_v22 = vrot.slane %v989_v30, 5  ;;  %v5347_v49 = vld [vmem:[%s5148_s14 + $0x2c] sm:$0x1]  ;;  %v1020_v29 = vrot.slane %v1018_v57, 4  ;;  %v5355_v30 = vcombine.low %v5320_v34, %v5332_v40 }
  0x23   : > { %6742 = vst [vmem:[#allocation13_spill] sm:$0xff] %v5339_v51  ;;  %v1015_v53 = vrot.slane %v1013_v44, 5  ;;  %v1023_v54 = vrot.slane %v1021_v61, 5  ;;  %v5358_v33 = vld [vmem:[%s5148_s14 + $0x78] sm:$0xf]  ;;  %v1027_v44 = vshll.u32 %v5206_v32, 16 }
  0x24   : > { %4377 = vmatpush3.bf16.msra.mxu1 %v5052_v37  ;;  %6743 = vst [vmem:[#allocation14_spill] sm:$0xff] %v5355_v30  ;;  %6744 = vst [vmem:[#allocation15_spill] sm:$0xff] %v5358_v33  ;;  %v5361_v52 = vld [vmem:[%s5148_s14 + $0x7c] sm:$0xf]  ;;  %v1033_v19 = vrot.slane %v1031_v62, 4  ;;  %v992_v48 = vsel %vm5327_vm3, %v5258_v56, %v991_v22  ;;  %v1037_v57 = vshll.u32 %v5347_v49, 16 }
  0x25   : > { %6745 = vst [vmem:[#allocation16_spill] sm:$0xff] %v5361_v52  ;;  %v1024_v35 = vor.u32 %v1023_v54, %v1020_v29  ;;  %v1029_v62 = vrot.slane %v1027_v44, 5  ;;  %v5378_v61 = vld [vmem:[%s5148_s14 + $0x84] sm:$0xf]  ;;  %v5381_v36 = vld [vmem:[%s5148_s14 + $0x88] sm:$0xf]  ;;  %v1016_v43 = vsel %vm5327_vm3, %v5290_v9, %v1015_v53  ;;  %v5390_v22 = vcombine.low %v5358_v33, %v5361_v52 }
  0x26   : > { %6746 = vst [vmem:[#allocation17_spill] sm:$0xff] %v5378_v61  ;;  %6747 = vst [vmem:[#allocation18_spill] sm:$0xff] %v5381_v36  ;;  %v1044_v54 = vrot.slane %v1042_v2, 4  ;;  %v1047_v1 = vrot.slane %v1045_v10, 5  ;;  %v1051_v44 = vshll.u32 %v5225_v42, 16  ;;  %v1057_v27 = vrot.slane %v1055_v11, 4 }
  0x27   : > { %4347 = vmatmul.mubr.msk.bf16.gmra.mrb[8].mxu1 %vm498_vm0, %v5263_v58  ;;  %6748 = vst [vmem:[#allocation19_spill] sm:$0xff] %v5390_v22  ;;  %v1034_v56 = vor.u32 %v1033_v19, %v1029_v62  ;;  %v5394_v25 = vcombine.low %v982_v39, %v992_v48  ;;  %v5400_v9 = vcombine.low %v5378_v61, %v5381_v36  ;;  %v5403_v17 = vld [vmem:[%s5148_s14 + $0x38] sm:$0x1]  ;;  %v5406_v2 = vld [vmem:[%s5148_s14 + $0x90] sm:$0xf]  ;;  %v1025_v10 = vrot.slane %v1024_v35, 4 }
  0x28   : > { %4350 = vmatprep.mubr.msk.bf16.mxu1 %vm498_vm0, %v5306_v18  ;;  %6751 = vst [vmem:[#allocation22_spill] sm:$0xff] %v5406_v2  ;;  %v5410_v19 = vcombine.low %v1006_v21, %v1016_v43  ;;  %v1039_v11 = vrot.slane %v1037_v57, 5  ;;  %v5412_v39 = vrot.slane %v1051_v44, 5  ;;  %v5415_v48 = vld [vmem:[%s5148_s14 + $0x94] sm:$0xf]  ;;  %v1048_v20 = vor.u32 %v1047_v1, %v1044_v54 }
  0x29   : > { %4489 = vmatmul.mubr.msk.bf16.gmra.mrb[8].mxu0 %vm498_vm0, %v5306_v18  ;;  %6749 = vst [vmem:[#allocation20_spill] sm:$0xff] %v5394_v25  ;;  %6750 = vst [vmem:[#allocation21_spill] sm:$0xff] %v5400_v9  ;;  %v1035_v53 = vrot.slane %v1034_v56, 4  ;;  %v5420_v29 = vld [vmem:[%s5148_s14 + $0x44] sm:$0x1]  ;;  %v1068_v16 = vrot.slane %v1066_v12, 4 }
  0x2a   : > { %4492 = vmatprep.mubr.msk.bf16.mxu0 %vm498_vm0, %v5316_v28  ;;  %6752 = vst [vmem:[#allocation23_spill] sm:$0xff] %v5410_v19  ;;  %6753 = vst [vmem:[#allocation24_spill] sm:$0xff] %v5415_v48  ;;  %v1058_v57 = vor.u32 %v1057_v27, %v5412_v39  ;;  %v1061_v43 = vshll.u32 %v5403_v17, 16  ;;  %v1075_v44 = vshll.u32 %v5237_v47, 16  ;;  %v6756_v18 = vshrl.u32 %v5237_v47, 16 }
  0x2b   : > { %6754 = vst [vmem:[#allocation25_spill] sm:$0xff] %v5420_v29  ;;  %v1030_v27 = vsel %vm5327_vm3, %v1025_v10, %v1029_v62  ;;  %v1085_v56 = vshll.u32 %v5420_v29, 16  ;;  %v5450_v62 = vld [vmem:[%s5148_s14 + $0x9c] sm:$0xf]  ;;  %v5454_v55 = vld [vmem:[%s5148_s14 + $0xa0] sm:$0xf] }
  0x2c   : > { %v1081_v12 = vrot.slane %v6756_v18, 4  ;;  %v1077_v35 = vrot.slane %v1075_v44, 5  ;;  %v1049_v18 = vrot.slane %v1048_v20, 4  ;;  %v1059_v10 = vrot.slane %v1058_v57, 4  ;;  %v5457_v24 = vld [vmem:[%s5148_s14 + $0x50] sm:$0x1] }
  0x2d   : > { %6758 = vst [vmem:[#allocation27_spill] sm:$0xff] %v5457_v24  ;;  %v6759_v20 = vshrl.u32 %v5266_v59, 16  ;;  %v6769_v29 = vshrl.u32 %v5279_v0, 16 }
  0x2e   : > { %v1082_v44 = vor.u32 %v1081_v12, %v1077_v35  ;;  %v1087_v12 = vrot.slane %v1085_v56, 5  ;;  %v5486_v56 = vld [vmem:[%s5148_s14 + $0xac] sm:$0xf] }
  0x2f   : > { %4351 = vmatmul.mubr.msk.bf16.gmra.mrb[12].mxu1 %vm498_vm0, %v5316_v28  ;;  %v6755_v28 = vshll.u32 %v5234_v46, 16  ;;  %6765 = vst [vmem:[#allocation31_spill] sm:$0xff] %v5486_v56 }
  0x30   : > { %4354 = vmatprep.mubr.msk.bf16.mxu1 %vm498_vm0, %v5339_v51 }
  0x31   : > { %v1071_v21 = vrot.slane %v6755_v28, 5  ;;  %4493 = vmatmul.mubr.msk.bf16.gmra.mrb[12].mxu0 %vm498_vm0, %v5339_v51  ;;  %v5440_v28 = vcombine.low %v5406_v2, %v5415_v48  ;;  %v1063_v51 = vrot.slane %v1061_v43, 5  ;;  %v1083_v43 = vrot.slane %v1082_v44, 4 }
  0x32   : > { %4514 = vmatprep.mubr.msk.bf16.mxu0 %vm498_vm0, %v5394_v25 }
  0x33   : > { %v1072_v1 = vor.u32 %v1071_v21, %v1068_v16  ;;  %6757 = vst [vmem:[#allocation26_spill] sm:$0xff] %v5440_v28  ;;  %v1040_v16 = vsel %vm5327_vm3, %v1035_v53, %v1039_v11  ;;  %v1092_v53 = vrot.slane %v6759_v20, 4  ;;  %v6760_v11 = vshll.u32 %v5266_v59, 16 }
  0x34   : > { %v1099_v21 = vshll.u32 %v5269_v60, 16  ;;  %v5466_v57 = vcombine.low %v1030_v27, %v1040_v16  ;;  %v1054_v20 = vsel %vm5327_vm3, %v1049_v18, %v5412_v39  ;;  %v5483_v16 = vld [vmem:[%s5148_s14 + $0xa8] sm:$0xf]  ;;  %v1064_v44 = vsel %vm5327_vm3, %v1059_v10, %v1063_v51  ;;  %v5493_v39 = vld [vmem:[%s5148_s14 + $0x5c] sm:$0x1] }
  0x35   : > { %v1073_v45 = vrot.slane %v1072_v1, 4  ;;  %v1095_v54 = vrot.slane %v6760_v11, 5  ;;  %v6762_v1 = vshrl.u32 %v5269_v60, 16  ;;  %v5477_v11 = vcombine.low %v5450_v62, %v5454_v55  ;;  %6764 = vst [vmem:[#allocation30_spill] sm:$0xff] %v5483_v16  ;;  %6766 = vst [vmem:[#allocation32_spill] sm:$0xff] %v5493_v39 }
  0x36   : > { %6761 = vst [vmem:[#allocation28_spill] sm:$0xff] %v5466_v57  ;;  %v5480_v27 = vrot.slane %v1099_v21, 5  ;;  %v6767_v18 = vshrl.u32 %v5276_v63, 16  ;;  %v5500_v21 = vld [vmem:[%s6642_s2 + $0x30] sm:$0xff]   ;;  %v6768_v10 = vshll.u32 %v5276_v63, 16  ;;  %v1123_v59 = vshll.u32 %v5279_v0, 16 }
  0x37   : > { %4355 = vmatmul.mubr.msk.bf16.gmra.mrb[16].mxu1 %vm498_vm0, %v5355_v30  ;;  %v1105_v58 = vrot.slane %v6762_v1, 4  ;;  %6763 = vst [vmem:[#allocation29_spill] sm:$0xff] %v5477_v11  ;;  %v1078_v30 = vsel %vm5327_vm3, %v1073_v45, %v1077_v35  ;;  %v1096_v51 = vor.u32 %v1095_v54, %v1092_v53  ;;  %v1129_v45 = vrot.slane %v6769_v29, 4 }
  0x38   : > { %4358 = vmatprep.mubr.msk.bf16.mxu1 %vm498_vm0, %v5390_v22  ;;  %v1109_v22 = vshll.u32 %v5457_v24, 16  ;;  %v1116_v25 = vrot.slane %v6767_v18, 4  ;;  %v1119_v1 = vrot.slane %v6768_v10, 5  ;;  %v1088_v18 = vsel %vm5327_vm3, %v1083_v43, %v1087_v12 }
  0x39   : > { %4515 = vmatmul.mubr.msk.bf16.vlgmr.msra.gmra.mrb[0].mxu0 %vm498_vm0, %v5410_v19  ;;  %v1106_v24 = vor.u32 %v1105_v58, %v5480_v27  ;;  %v5518_v35 = vcombine.low %v1054_v20, %v1064_v44  ;;  %v5522_v54 = vcombine.low %v5483_v16, %v5486_v56  ;;  %v1133_v43 = vshll.u32 %v5493_v39, 16 }
  0x3a   : > { %4547 = vmatpush3.bf16.msra.mxu0 %v5195_v26  ;;  %4518 = vmatprep.mubr.msk.bf16.mxu0 %vm498_vm0, %v5466_v57  ;;  %v1120_v53 = vor.u32 %v1119_v1, %v1116_v25  ;;  %v1111_v58 = vrot.slane %v1109_v22, 5  ;;  %v1125_v10 = vrot.slane %v1123_v59, 5  ;;  %v5528_v26 = vld [vmem:[%s5148_s14 + $0x68] sm:$0x1]  ;;  %v5531_v20 = vcombine.low %v1078_v30, %v1088_v18  ;;  %v5543_v30 = vld [vmem:[%s5148_s14 + $0x74] sm:$0x1] }
  0x3b   : > { %6770 = vst [vmem:[#allocation33_spill] sm:$0xff] %v5518_v35  ;;  %6771 = vst [vmem:[#allocation34_spill] sm:$0xff] %v5522_v54  ;;  %4580 = vmatprep.subr.bf16.mxu0 %v5500_v21  ;;  %v1097_v44 = vrot.slane %v1096_v51, 4  ;;  %v6774_v60 = vshrl.u32 %v5285_v3, 16  ;;  %v6775_v1 = vshll.u32 %v5285_v3, 16  ;;  %v1107_v22 = vrot.slane %v1106_v24, 4 }
  0x3c   : > { %6772 = vst [vmem:[#allocation35_spill] sm:$0xff] %v5528_v26  ;;  %6773 = vst [vmem:[#allocation36_spill] sm:$0xff] %v5531_v20  ;;  %v1130_v29 = vor.u32 %v1129_v45, %v1125_v10  ;;  %v1147_v59 = vshll.u32 %v5298_v13, 16  ;;  %v6776_v12 = vshrl.u32 %v5298_v13, 16  ;;  %v1135_v51 = vrot.slane %v1133_v43, 5 }
  0x3d   : > { %v1140_v25 = vrot.slane %v6774_v60, 4  ;;  %v1143_v57 = vrot.slane %v6775_v1, 5  ;;  %6777 = vst [vmem:[#allocation37_spill] sm:$0xff] %v5543_v30  ;;  %v1121_v60 = vrot.slane %v1120_v53, 4  ;;  %v1157_v18 = vshll.u32 %v5528_v26, 16  ;;  %v300_v26 = vld [vmem:[%s5579_s9] sm:$0xff] }
  0x3e   : > { %v1153_v19 = vrot.slane %v6776_v12, 4  ;;  %v1131_v24 = vrot.slane %v1130_v29, 4  ;;  %v5549_v45 = vrot.slane %v1147_v59, 5  ;;  %v6778_v1 = vshrl.u32 %v5320_v34, 16  ;;  %v5560_v43 = vld [vmem:[%s5148_s14 + $0xb4] sm:$0xf] }
  0x3f   : > { %4359 = vmatmul.mubr.msk.bf16.gmra.mrb[20].mxu1 %vm498_vm0, %v5400_v9  ;;  %v1144_v3 = vor.u32 %v1143_v57, %v1140_v25  ;;  %v6779_v12 = vshll.u32 %v5320_v34, 16  ;;  %v1102_v53 = vsel %vm5327_vm3, %v1097_v44, %v5480_v27  ;;  %v1171_v25 = vshll.u32 %v5332_v40, 16  ;;  %v5583_v57 = vld [vmem:[%s5148_s14 + $0x80] sm:$0x1] }
  0x40   : > { %4362 = vmatprep.mubr.msk.bf16.mxu1 %vm498_vm0, %v5440_v28  ;;  %v1164_v9 = vrot.slane %v6778_v1, 4  ;;  %v6780_v29 = vshrl.u32 %v5332_v40, 16  ;;  %v5568_v1 = vld [vmem:[%s6642_s2 + $0x8] sm:$0xff]   ;;  %v1154_v44 = vor.u32 %v1153_v19, %v5549_v45  ;;  %6781 = vst [vmem:[#allocation38_spill] sm:$0xff] %v5583_v57  ;;  %v1112_v27 = vsel %vm5327_vm3, %v1107_v22, %v1111_v58 }
  0x41   : > { %v1167_v13 = vrot.slane %v6779_v12, 5  ;;  %4519 = vmatmul.mubr.msk.bf16.gmra.mrb[4].mxu0 %vm498_vm0, %v5518_v35  ;;  %v1126_v19 = vsel %vm5327_vm3, %v1121_v60, %v1125_v10  ;;  %v1145_v28 = vrot.slane %v1144_v3, 4  ;;  %v1173_v35 = vrot.slane %v1171_v25, 5  ;;  %4410 = vmatprep.subr.bf16.mxu1 %v5568_v1  ;;  %v5599_v40 = vld [vmem:[%s5579_s9 + $0x8] sm:$0xff] }
  0x42   : > { %v1177_v59 = vrot.slane %v6780_v29, 4  ;;  %v1181_v29 = vshll.u32 %v5543_v30, 16  ;;  %4522 = vmatprep.mubr.msk.bf16.mxu0 %vm498_vm0, %v5531_v20  ;;  %v1155_v30 = vrot.slane %v1154_v44, 4  ;;  %v1159_v34 = vrot.slane %v1157_v18, 5  ;;  %6782 = vst [vmem:[#allocation39_spill] sm:$0xff] %v5599_v40 }
  0x43   : > { %v1168_v12 = vor.u32 %v1167_v13, %v1164_v9  ;;  %v1136_v13 = vsel %vm5327_vm3, %v1131_v24, %v1135_v51  ;;  %v5595_v9 = vld [vmem:[%s5148_s14 + $0xb8] sm:$0xf]  ;;  %v6783_v10 = vshrl.u32 %v5358_v33, 16  ;;  %v6784_v60 = vshll.u32 %v5358_v33, 16 }
  0x44   : > { %v1178_v58 = vor.u32 %v1177_v59, %v1173_v35  ;;  %v1195_v25 = vshll.u32 %v5361_v52, 16  ;;  %v5608_v51 = vcombine.low %v1102_v53, %v1112_v27  ;;  %v1183_v18 = vrot.slane %v1181_v29, 5 }
  0x45   : > { %v1169_v20 = vrot.slane %v1168_v12, 4  ;;  %v1188_v22 = vrot.slane %v6783_v10, 4  ;;  %v1191_v3 = vrot.slane %v6784_v60, 5  ;;  %v6786_v24 = vshrl.u32 %v5361_v52, 16  ;;  %v5620_v60 = vld [vmem:[%s5148_s14 + $0x8c] sm:$0x1] }
  0x46   : > { %6785 = vst [vmem:[#allocation40_spill] sm:$0xff] %v5608_v51  ;;  %v5614_v59 = vcombine.low %v1126_v19, %v1136_v13  ;;  %v5616_v12 = vrot.slane %v1195_v25, 5  ;;  %v1205_v10 = vshll.u32 %v5583_v57, 16  ;;  %6788 = vst [vmem:[#allocation42_spill] sm:$0xff] %v5620_v60  ;;  %v1179_v33 = vrot.slane %v1178_v58, 4 }
  0x47   : > { %4363 = vmatmul.mubr.msk.bf16.gmra.mrb[24].mxu1 %vm498_vm0, %v5477_v11  ;;  %v1201_v44 = vrot.slane %v6786_v24, 4  ;;  %v6789_v11 = vshrl.u32 %v5378_v61, 16  ;;  %v6790_v27 = vshll.u32 %v5378_v61, 16  ;;  %v1219_v24 = vshll.u32 %v5381_v36, 16 }
  0x48   : > { %4366 = vmatprep.mubr.msk.bf16.mxu1 %vm498_vm0, %v5522_v54  ;;  %6787 = vst [vmem:[#allocation41_spill] sm:$0xff] %v5614_v59  ;;  %v5629_v19 = vcombine.low %v5560_v43, %v5595_v9  ;;  %v1192_v25 = vor.u32 %v1191_v3, %v1188_v22  ;;  %v6792_v54 = vshrl.u32 %v5381_v36, 16  ;;  %v1150_v22 = vsel %vm5327_vm3, %v1145_v28, %v5549_v45 }
  0x49   : > { %v1212_v53 = vrot.slane %v6789_v11, 4  ;;  %v1215_v29 = vrot.slane %v6790_v27, 5  ;;  %4523 = vmatmul.mubr.msk.bf16.gmra.mrb[8].mxu0 %vm498_vm0, %v5608_v51  ;;  %v332_v27 = vpack.c.bf16 %v5599_v40, %v300_v26  ;;  %v1202_v61 = vor.u32 %v1201_v44, %v5616_v12  ;;  %v302_v44 = vld [vmem:[%s5579_s9 + $0x10] sm:$0xff]  ;;  %v5682_v51 = vld [vmem:[%s5148_s14 + $0xa4] sm:$0x1] }
  0x4a   : > { %6791 = vst [vmem:[#allocation43_spill] sm:$0xff] %v5629_v19  ;;  %v1225_v58 = vrot.slane %v6792_v54, 4  ;;  %v5639_v57 = vrot.slane %v1219_v24, 5  ;;  %4526 = vmatprep.mubr.msk.bf16.mxu0 %vm498_vm0, %v5614_v59  ;;  %v1160_v54 = vsel %vm5327_vm3, %v1155_v30, %v1159_v34  ;;  %v1174_v3 = vsel %vm5327_vm3, %v1169_v20, %v1173_v35  ;;  %v5654_v24 = vld [vmem:[%s5579_s9 + $0x18] sm:$0xff]  ;;  %v5677_v40 = vld [vmem:[%s5579_s9 + $0x30] sm:$0xff] }
  0x4b   : > { %v1216_v11 = vor.u32 %v1215_v29, %v1212_v53  ;;  %v1184_v26 = vsel %vm5327_vm3, %v1179_v33, %v1183_v18  ;;  %6793 = vst [vmem:[#allocation44_spill] sm:$0xff] %v5654_v24  ;;  %v1207_v13 = vrot.slane %v1205_v10, 5  ;;  %v1229_v45 = vshll.u32 %v5620_v60, 16  ;;  %v5659_v30 = vld [vmem:[%s5148_s14 + $0x98] sm:$0x1]  ;;  %6799 = vst [vmem:[#allocation48_spill] sm:$0xff] %v5677_v40 }
  0x4c   : > { %v1226_v28 = vor.u32 %v1225_v58, %v5639_v57  ;;  %v1193_v34 = vrot.slane %v1192_v25, 4  ;;  %v6794_v35 = vshrl.u32 %v5406_v2, 16  ;;  %v6795_v53 = vshll.u32 %v5406_v2, 16  ;;  %v5671_v58 = vld [vmem:[%s5579_s9 + $0x20] sm:$0xff]  ;;  %v5674_v25 = vld [vmem:[%s5579_s9 + $0x28] sm:$0xff] }
  0x4d   : > { %v1243_v18 = vshll.u32 %v5415_v48, 16  ;;  %v5668_v10 = vcombine.low %v1150_v22, %v1160_v54  ;;  %v1203_v29 = vrot.slane %v1202_v61, 4  ;;  %6797 = vst [vmem:[#allocation46_spill] sm:$0xff] %v5671_v58  ;;  %6798 = vst [vmem:[#allocation47_spill] sm:$0xff] %v5674_v25  ;;  %v6800_v59 = vshrl.u32 %v5415_v48, 16 }
  0x4e   : > { %v1236_v20 = vrot.slane %v6794_v35, 4  ;;  %v1239_v33 = vrot.slane %v6795_v53, 5  ;;  %v5685_v53 = vcombine.low %v1174_v3, %v1184_v26  ;;  %v1217_v2 = vrot.slane %v1216_v11, 4 }
  0x4f   : > { %4367 = vmatmul.mubr.msk.bf16.gmra.mrb[28].mxu1 %vm498_vm0, %v5629_v19  ;;  %6796 = vst [vmem:[#allocation45_spill] sm:$0xff] %v5668_v10  ;;  %v1249_v35 = vrot.slane %v6800_v59, 4  ;;  %v5688_v19 = vld [vmem:[%s5579_s9 + $0x38] sm:$0xff]  ;;  %v5690_v22 = vrot.slane %v1243_v18, 5  ;;  %v6803_v61 = vshrl.u32 %v5450_v62, 16  ;;  %v1227_v60 = vrot.slane %v1226_v28, 4 }
  0x50   : > { %4378 = vmatprep.mubr.msk.bf16.mxu1 %vm732_vm4, %v332_v27  ;;  %6801 = vst [vmem:[#allocation49_spill] sm:$0xff] %v5685_v53  ;;  %6802 = vst [vmem:[#allocation50_spill] sm:$0xff] %v5688_v19  ;;  %v1231_v36 = vrot.slane %v1229_v45, 5  ;;  %v6804_v52 = vshll.u32 %v5450_v62, 16  ;;  %v1267_v59 = vshll.u32 %v5454_v55, 16  ;;  %v333_v39 = vpack.c.bf16 %v5654_v24, %v302_v44 }
  0x51   : > { %v1260_v54 = vrot.slane %v6803_v61, 4  ;;  %v1198_v11 = vsel %vm5327_vm3, %v1193_v34, %v5616_v12  ;;  %v1240_v27 = vor.u32 %v1239_v33, %v1236_v20  ;;  %v6805_v3 = vshrl.u32 %v5454_v55, 16  ;;  %4527 = vmatmul.mubr.msk.bf16.gmra.mrb[12].mxu0 %vm498_vm0, %v5668_v10  ;;  %v5725_v61 = vld [vmem:[%s6642_s2 + $0x10] sm:$0xff]   ;;  %v5751_v24 = vld [vmem:[%s5148_s14 + $0xc0] sm:$0xf] }
  0x52   : > { %v1263_v48 = vrot.slane %v6804_v52, 5  ;;  %v1208_v52 = vsel %vm5327_vm3, %v1203_v29, %v1207_v13  ;;  %v1250_v28 = vor.u32 %v1249_v35, %v5690_v22  ;;  %v1253_v44 = vshll.u32 %v5659_v30, 16  ;;  %4530 = vmatprep.mubr.msk.bf16.mxu0 %vm498_vm0, %v5685_v53 }
  0x53   : > { %v1273_v26 = vrot.slane %v6805_v3, 4  ;;  %v1269_v45 = vrot.slane %v1267_v59, 5  ;;  %v334_v12 = vpack.c.bf16 %v5674_v25, %v5671_v58  ;;  %v335_v34 = vpack.c.bf16 %v5688_v19, %v5677_v40  ;;  %v5733_v3 = vld [vmem:[%s5579_s9 + $0x48] sm:$0xff]  ;;  %v5741_v19 = vld [vmem:[%s5148_s14 + $0xb0] sm:$0x1] }
  0x54   : > { %v1264_v20 = vor.u32 %v1263_v48, %v1260_v54  ;;  %v1277_v13 = vshll.u32 %v5682_v51, 16  ;;  %v1222_v33 = vsel %vm5327_vm3, %v1217_v2, %v5639_v57  ;;  %v1232_v18 = vsel %vm5327_vm3, %v1227_v60, %v1231_v36  ;;  %v5730_v54 = vld [vmem:[%s5579_s9 + $0x40] sm:$0xff]  ;;  %6808 = vst [vmem:[#allocation53_spill] sm:$0xff] %v5733_v3  ;;  %6811 = vst [vmem:[#allocation54_spill] sm:$0xff] %v5741_v19 }
  0x55   : > { %v1274_v29 = vor.u32 %v1273_v26, %v1269_v45  ;;  %v1291_v35 = vshll.u32 %v5486_v56, 16  ;;  %v5727_v59 = vcombine.low %v1198_v11, %v1208_v52  ;;  %v1241_v48 = vrot.slane %v1240_v27, 4  ;;  %6807 = vst [vmem:[#allocation52_spill] sm:$0xff] %v5730_v54 }
  0x56   : > { %v6809_v2 = vshrl.u32 %v5483_v16, 16  ;;  %v6810_v36 = vshll.u32 %v5483_v16, 16  ;;  %v1251_v26 = vrot.slane %v1250_v28, 4  ;;  %v1255_v25 = vrot.slane %v1253_v44, 5  ;;  %v5811_v16 = vld [vmem:[%s5579_s9 + $0x60] sm:$0xff] }
  0x57   : > { %6806 = vst [vmem:[#allocation51_spill] sm:$0xff] %v5727_v59  ;;  %4379 = vmatmul.mubr.msk.bf16.vlgmr.msra.gmra.mrb[0].mxu1 %vm732_vm4, %v333_v39  ;;  %v5743_v11 = vrot.slane %v1291_v35, 5  ;;  %v6812_v27 = vshrl.u32 %v5486_v56, 16  ;;  %v5748_v58 = vcombine.low %v1222_v33, %v1232_v18  ;;  %v1275_v40 = vrot.slane %v1274_v29, 4  ;;  %v5762_v18 = vld [vmem:[%s5148_s14 + $0xc4] sm:$0xf] }
  0x58   : > { %v1284_v57 = vrot.slane %v6809_v2, 4  ;;  %v1287_v60 = vrot.slane %v6810_v36, 5  ;;  %4382 = vmatprep.mubr.msk.bf16.mxu1 %vm732_vm4, %v334_v12  ;;  %v1265_v2 = vrot.slane %v1264_v20, 4  ;;  %v1279_v36 = vrot.slane %v1277_v13, 5  ;;  %4411 = vmatpush3.bf16.msra.mxu1 %v5568_v1 }
  0x59   : > { %v1297_v52 = vrot.slane %v6812_v27, 4  ;;  %6813 = vst [vmem:[#allocation55_spill] sm:$0xff] %v5748_v58  ;;  %v6814_v39 = vshrl.u32 %v5560_v43, 16  ;;  %v6815_v44 = vshll.u32 %v5560_v43, 16  ;;  %v1315_v27 = vshll.u32 %v5595_v9, 16  ;;  %4444 = vmatprep.subr.bf16.mxu1 %v5725_v61  ;;  %4531 = vmatmul.mubr.msk.bf16.gmra.mrb[16].mxu0 %vm498_vm0, %v5727_v59 }
  0x5a   : > { %v6816_v12 = vshrl.u32 %v5595_v9, 16  ;;  %v1246_v20 = vsel %vm5327_vm3, %v1241_v48, %v5690_v22  ;;  %v336_v1 = vpack.c.bf16 %v5733_v3, %v5730_v54  ;;  %v1288_v13 = vor.u32 %v1287_v60, %v1284_v57  ;;  %4534 = vmatprep.mubr.msk.bf16.mxu0 %vm498_vm0, %v5748_v58  ;;  %v5807_v54 = vld [vmem:[%s5579_s9 + $0x58] sm:$0xff] }
  0x5b   : > { %v1308_v28 = vrot.slane %v6814_v39, 4  ;;  %v1311_v35 = vrot.slane %v6815_v44, 5  ;;  %v1301_v29 = vshll.u32 %v5741_v19, 16  ;;  %v5772_v39 = vld [vmem:[%s5148_s14 + $0xbc] sm:$0x1]  ;;  %v1256_v44 = vsel %vm5327_vm3, %v1251_v26, %v1255_v25 }
  0x5c   : > { %v1321_v33 = vrot.slane %v6816_v12, 4  ;;  %v1298_v12 = vor.u32 %v1297_v52, %v5743_v11  ;;  %v1317_v53 = vrot.slane %v1315_v27, 5  ;;  %v2267_v10 = vshrl.u32 %v5751_v24, 16 }
  0x5d   : > { %v1270_v22 = vsel %vm5327_vm3, %v1265_v2, %v1269_v45  ;;  %v1280_v48 = vsel %vm5327_vm3, %v1275_v40, %v1279_v36  ;;  %v2270_v57 = vshll.u32 %v5751_v24, 16  ;;  %v2276_v25 = vshll.u32 %v5762_v18, 16  ;;  %v5063_v45 = vld [vmem:[%s6646_s6 + $0x18] sm:$0xff]  }
  0x5e   : > { %v1312_v60 = vor.u32 %v1311_v35, %v1308_v28  ;;  %v1322_v26 = vor.u32 %v1321_v33, %v1317_v53  ;;  %v1325_v52 = vshll.u32 %v5772_v39, 16  ;;  %v2280_v27 = vshrl.u32 %v5762_v18, 16  ;;  %v5804_v33 = vld [vmem:[%s5579_s9 + $0x50] sm:$0xff] }
  0x5f   : > { %v6819_v40 = vrot.slane %v5179_v15, 5  ;;  %v5798_v36 = vcombine.low %v1246_v20, %v1256_v44  ;;  %v1289_v3 = vrot.slane %v1288_v13, 4  ;;  %v1303_v28 = vrot.slane %v1301_v29, 5  ;;  %4383 = vmatmul.mubr.msk.bf16.gmra.mrb[4].mxu1 %vm732_vm4, %v335_v34  ;;  %v5814_v20 = vld [vmem:[%s5579_s9 + $0x68] sm:$0xff] }
  0x60   : > { %v5801_v35 = vcombine.low %v1270_v22, %v1280_v48  ;;  %v1299_v58 = vrot.slane %v1298_v12, 4  ;;  %v2269_v59 = vrot.slane %v2267_v10, 4  ;;  %v2272_v19 = vrot.slane %v2270_v57, 5  ;;  %4386 = vmatprep.mubr.msk.bf16.mxu1 %vm732_vm4, %v336_v1 }
  0x61   : > { %v1664_v2 = vrot.slane %v6819_v40, 4  ;;  %v2278_v13 = vrot.slane %v2276_v25, 5  ;;  %v2282_v29 = vrot.slane %v2280_v27, 4  ;;  %v6820_v34 = vrot.slane %v5162_v8, 5  ;;  %v5824_v40 = vld [vmem:[%s5148_s14 + $0xc8] sm:$0x1]  ;;  %4535 = vmatmul.mubr.msk.bf16.gmra.mrb[20].mxu0 %vm498_vm0, %v5798_v36 }
  0x62   : > { %v6821_v44 = vrot.slane %v5157_v6, 9  ;;  %v1658_v48 = vrot.slane %v5288_v7, 5  ;;  %v1313_v12 = vrot.slane %v1312_v60, 4  ;;  %v1323_v10 = vrot.slane %v1322_v26, 4  ;;  %4538 = vmatprep.mubr.msk.bf16.mxu0 %vm498_vm0, %v5801_v35 }
  0x63   : > { %v1327_v57 = vrot.slane %v1325_v52, 5  ;;  %v6822_v1 = vrot.slane %v5179_v15, 5  ;;  %v6823_v56 = vrot.slane %v5176_v14, 9  ;;  %v6824_v8 = vshll.u32 %v5151_v4, 16 }
  0x64   : > { %v1656_v22 = vsel %vm5792_vm7, %v6821_v44, %v6820_v34  ;;  %v337_v27 = vpack.c.bf16 %v5807_v54, %v5804_v33  ;;  %v1659_v7 = vsel %vm5792_vm7, %v5245_v50, %v1658_v48  ;;  %v1665_v60 = vrot.slane %v5310_v23, 5  ;;  %v5874_v44 = vld [vmem:[%s5579_s9 + $0x70] sm:$0xff] }
  0x65   : > { %v1663_v25 = vsel %vm5792_vm7, %v6823_v56, %v6822_v1  ;;  %v951_v6 = vrot.slane %v6824_v8, 5  ;;  %v1294_v14 = vsel %vm5327_vm3, %v1289_v3, %v5743_v11  ;;  %v1304_v4 = vsel %vm5327_vm3, %v1299_v58, %v1303_v28 }
  0x66   : > { %v338_v15 = vpack.c.bf16 %v5814_v20, %v5811_v16  ;;  %v5849_v56 = vcombine.low %v1656_v22, %v1659_v7  ;;  %v2273_v50 = vor.u32 %v2272_v19, %v2269_v59  ;;  %v2283_v23 = vor.u32 %v2282_v29, %v2278_v13  ;;  %v5877_v22 = vld [vmem:[%s5579_s9 + $0x78] sm:$0xff] }
  0x67   : > { %v2286_v26 = vshll.u32 %v5824_v40, 16  ;;  %v1666_v3 = vsel %vm5792_vm7, %v1664_v2, %v1665_v60  ;;  %v1318_v58 = vsel %vm5327_vm3, %v1313_v12, %v1317_v53  ;;  %v1328_v11 = vsel %vm5327_vm3, %v1323_v10, %v1327_v57  ;;  %4387 = vmatmul.mubr.msk.bf16.gmra.mrb[8].mxu1 %vm732_vm4, %v337_v27  ;;  %v5880_v10 = vld [vmem:[%s5579_s9 + $0x80] sm:$0xff]  ;;  %v5899_v60 = vld [vmem:[%s5148_s14 + $0x8] sm:$0x1] }
  0x68   : > { %v5860_v52 = vcombine.low %v1663_v25, %v1666_v3  ;;  %v952_v28 = vor.u32 %v951_v6, %v5218_v38  ;;  %v6825_v19 = vshll.u32 %v5154_v5, 16  ;;  %v6826_v29 = vshrl.u32 %v5154_v5, 16  ;;  %4390 = vmatprep.mubr.msk.bf16.mxu1 %vm732_vm4, %v338_v15  ;;  %v5883_v5 = vld [vmem:[%s5579_s9 + $0x88] sm:$0xff] }
  0x69   : > { %v5868_v2 = vcombine.low %v1294_v14, %v1304_v4  ;;  %v5871_v53 = vcombine.low %v1318_v58, %v1328_v11  ;;  %v2274_v38 = vrot.slane %v2273_v50, 4  ;;  %v2284_v48 = vrot.slane %v2283_v23, 4  ;;  %v5911_v50 = vld [vmem:[%s5579_s9 + $0x98] sm:$0xff] }
  0x6a   : > { %v957_v59 = vrot.slane %v6825_v19, 5  ;;  %v961_v34 = vrot.slane %v6826_v29, 4  ;;  %v2288_v12 = vrot.slane %v2286_v26, 5  ;;  %v953_v57 = vrot.slane %v952_v28, 4  ;;  %v5918_v26 = vld [vmem:[%s5579_s9 + $0xa8] sm:$0xff] }
  0x6b   : > { %4539 = vmatmul.mubr.msk.bf16.gmra.mrb[24].mxu0 %vm498_vm0, %v5868_v2  ;;  %v339_v1 = vpack.c.bf16 %v5877_v22, %v5874_v44  ;;  %v2279_v8 = vsel %vm5327_vm3, %v2274_v38, %v2278_v13  ;;  %v340_v27 = vpack.c.bf16 %v5883_v5, %v5880_v10  ;;  %v1669_v7 = vrot.slane %v5206_v32, 5  ;;  %v5908_v13 = vld [vmem:[%s5579_s9 + $0x90] sm:$0xff]  ;;  %v5915_v32 = vld [vmem:[%s5579_s9 + $0xa0] sm:$0xff]  ;;  %6827 = vst [vmem:[#allocation56_spill] sm:$0xff] %v5918_v26 }
  0x6c   : > { %v962_v25 = vor.u32 %v961_v34, %v957_v59  ;;  %4542 = vmatprep.mubr.msk.bf16.mxu0 %vm498_vm0, %v5871_v53  ;;  %v2289_v6 = vsel %vm5327_vm3, %v2284_v48, %v2288_v12  ;;  %v958_v4 = vsel %vm5327_vm3, %v953_v57, %v957_v59  ;;  %v965_v23 = vshll.u32 %v5899_v60, 16  ;;  %v5940_v12 = vld [vmem:[%s5579_s9 + $0xb0] sm:$0xff]  ;;  %v5943_v57 = vld [vmem:[%s5579_s9 + $0xb8] sm:$0xff] }
  0x6d   : > { %v5902_v14 = vcombine.low %v2279_v8, %v2289_v6  ;;  %v3955_v3 = vrot.slane %v5203_v31, 9  ;;  %v1671_v58 = vrot.slane %v1669_v7, 4  ;;  %v1672_v11 = vrot.slane %v5347_v49, 5  ;;  %v5068_v49 = vld [vmem:[%s5148_s14 + $0x4] sm:$0xf] }
  0x6e   : > { %v963_v15 = vrot.slane %v962_v25, 4  ;;  %v1676_v28 = vrot.slane %v5225_v42, 5  ;;  %v967_v19 = vrot.slane %v965_v23, 5  ;;  %v341_v59 = vpack.c.bf16 %v5911_v50, %v5908_v13  ;;  %v5950_v6 = vld [vmem:[%s5579_s9 + $0xc0] sm:$0xff] }
  0x6f   : > { %4391 = vmatmul.mubr.msk.bf16.gmra.mrb[12].mxu1 %vm732_vm4, %v339_v1  ;;  %v342_v31 = vpack.c.bf16 %v5918_v26, %v5915_v32  ;;  %v1683_v29 = vrot.slane %v5237_v47, 5  ;;  %v1648_v34 = vrot.slane %v5068_v49, 5  ;;  %v1670_v38 = vsel %vm5792_vm7, %v3955_v3, %v1669_v7  ;;  %6828 = vst [vmem:[#allocation57_spill] sm:$0xff] %v5950_v6 }
  0x70   : > { %4394 = vmatprep.mubr.msk.bf16.mxu1 %vm732_vm4, %v340_v27  ;;  %v968_v42 = vsel %vm5327_vm3, %v963_v15, %v967_v19  ;;  %v1673_v48 = vsel %vm5792_vm7, %v1671_v58, %v1672_v11  ;;  %v3956_v47 = vrot.slane %v5222_v41, 9  ;;  %v1678_v25 = vrot.slane %v1676_v28, 4  ;;  %v5953_v27 = vld [vmem:[%s5579_s9 + $0xc8] sm:$0xff]  ;;  %v5069_v58 = vld [vmem:[%s5148_s14] sm:$0xf] }
  0x71   : > { %v5945_v1 = vcombine.low %v958_v4, %v968_v42  ;;  %v1679_v8 = vrot.slane %v5403_v17, 5  ;;  %6829 = vst [vmem:[#allocation58_spill] sm:$0xff] %v5953_v27  ;;  %v3957_v7 = vrot.slane %v5234_v46, 9  ;;  %v5958_v15 = vcombine.low %v1670_v38, %v1673_v48  ;;  %v6830_v4 = vld [vmem:[#allocation25_spill] sm:$0xff]  ;;  %v6831_v38 = vld [vmem:[#allocation6_spill] sm:$0xff] }
  0x72   : > { %v1685_v23 = vrot.slane %v1683_v29, 4  ;;  %v1686_v3 = vrot.slane %v6830_v4, 5  ;;  %v3952_v41 = vrot.slane %v5069_v58, 9  ;;  %v1650_v11 = vrot.slane %v1648_v34, 4  ;;  %v5969_v46 = vld [vmem:[%s6642_s2 + $0x38] sm:$0xff]   ;;  %v6832_v4 = vld [vmem:[#allocation7_spill] sm:$0xff] }
  0x73   : > { %4543 = vmatmul.mubr.msk.bf16.gmra.mrb[28].mxu0 %vm498_vm0, %v5902_v14  ;;  %v343_v17 = vpack.c.bf16 %v5943_v57, %v5940_v12  ;;  %v344_v19 = vpack.c.bf16 %v5953_v27, %v5950_v6  ;;  %v1684_v42 = vsel %vm5792_vm7, %v3957_v7, %v1683_v29  ;;  %v3967_v49 = vrot.slane %v5560_v43, 9  ;;  %v6833_v43 = vld [vmem:[#allocation27_spill] sm:$0xff] }
  0x74   : > { %4548 = vmatprep.mubr.msk.bf16.mxu0 %vm498_vm0, %v5849_v56  ;;  %v3958_v48 = vrot.slane %v6831_v38, 9  ;;  %v1690_v58 = vrot.slane %v6832_v4, 5  ;;  %v1753_v27 = vrot.slane %v5595_v9, 5  ;;  %v1756_v6 = vrot.slane %v5772_v39, 5  ;;  %v6838_v38 = vld [vmem:[#allocation32_spill] sm:$0xff] }
  0x75   : > { %v1693_v29 = vrot.slane %v6833_v43, 5  ;;  %v2504_v39 = vrot.slane %v5824_v40, 5  ;;  %v3959_v40 = vrot.slane %v5276_v63, 9 }
  0x76   : > { %v1755_v9 = vrot.slane %v1753_v27, 4  ;;  %v1691_v43 = vsel %vm5792_vm7, %v3958_v48, %v1690_v58 }
  0x77   : > { %4395 = vmatmul.mubr.msk.bf16.gmra.mrb[16].mxu1 %vm732_vm4, %v341_v59  ;;  %v1677_v59 = vsel %vm5792_vm7, %v3956_v47, %v1676_v28  ;;  %v1687_v28 = vsel %vm5792_vm7, %v1685_v23, %v1686_v3  ;;  %v1697_v47 = vrot.slane %v5279_v0, 5  ;;  %v6001_v0 = vsel %vm5792_vm7, %v3952_v41, %v1648_v34  ;;  %v6021_v41 = vld [vmem:[%s5579_s9 + $0xd8] sm:$0xff] }
  0x78   : > { %4398 = vmatprep.mubr.msk.bf16.mxu1 %vm732_vm4, %v342_v31  ;;  %v1680_v31 = vsel %vm5792_vm7, %v1678_v25, %v1679_v8  ;;  %v4043_v25 = vrot.slane %v5751_v24, 9  ;;  %v1754_v8 = vsel %vm5792_vm7, %v3967_v49, %v1753_v27  ;;  %v1651_v23 = vrot.slane %v5899_v60, 5  ;;  %v6018_v60 = vld [vmem:[%s5579_s9 + $0xd0] sm:$0xff]  ;;  %6835 = vst [vmem:[#allocation6_spill] sm:$0xff] %v6021_v41 }
  0x79   : > { %v5997_v7 = vcombine.low %v1677_v59, %v1680_v31  ;;  %v6006_v27 = vcombine.low %v5751_v24, %v5762_v18  ;;  %v1757_v3 = vsel %vm5792_vm7, %v1755_v9, %v1756_v6  ;;  %v6015_v34 = vcombine.low %v1684_v42, %v1687_v28  ;;  %6834 = vst [vmem:[#allocation25_spill] sm:$0xff] %v6018_v60  ;;  %v6030_v6 = vld [vmem:[%s5579_s9 + $0xe0] sm:$0xff]  ;;  %v6839_v9 = vld [vmem:[#allocation8_spill] sm:$0xff] }
  0x7a   : > { %v1692_v24 = vrot.slane %v1690_v58, 4  ;;  %v6027_v63 = vsel %vm5792_vm7, %v1650_v11, %v1651_v23  ;;  %6836 = vst [vmem:[#allocation7_spill] sm:$0xff] %v6030_v6  ;;  %v1699_v49 = vrot.slane %v1697_v47, 4  ;;  %v345_v11 = vpack.c.bf16 %v6021_v41, %v6018_v60  ;;  %v6067_v58 = vld [vmem:[%s5579_s9 + $0xf0] sm:$0xff] }
  0x7b   : > { %4549 = vmatmul.mubr.msk.bf16.vlgmr.msra.gmra.mrb[0].mxu0 %vm498_vm0, %v5860_v52  ;;  %6841 = vst [vmem:[#allocation32_spill] sm:$0xff] %v6067_v58 }
  0x7c   : > { %4581 = vmatpush3.bf16.msra.mxu0 %v5500_v21  ;;  %4552 = vmatprep.mubr.msk.bf16.mxu0 %vm498_vm0, %v5958_v15  ;;  %v2501_v21 = vrot.slane %v5762_v18, 5  ;;  %v6023_v18 = vcombine.low %v1754_v8, %v1757_v3  ;;  %v6840_v3 = vld [vmem:[#allocation12_spill] sm:$0xff] }
  0x7d   : > { %4614 = vmatprep.subr.bf16.mxu0 %v5969_v46 }
  0x7e   : > { %v2502_v59 = vsel %vm5792_vm7, %v4043_v25, %v2501_v21  ;;  %v2503_v31 = vrot.slane %v2501_v21, 4  ;;  %v1694_v25 = vsel %vm5792_vm7, %v1692_v24, %v1693_v29  ;;  %v1704_v21 = vrot.slane %v6839_v9, 5  ;;  %v6070_v29 = vld [vmem:[%s5579_s9 + $0xf8] sm:$0xff]  ;;  %v5070_v24 = vld [vmem:[%s5148_s14 + $0x60] sm:$0xf] }
  0x7f   : > { %4399 = vmatmul.mubr.msk.bf16.gmra.mrb[20].mxu1 %vm732_vm4, %v343_v17  ;;  %v6033_v17 = vld [vmem:[%s5579_s9 + $0xe8] sm:$0xff]  ;;  %6842 = vst [vmem:[#allocation8_spill] sm:$0xff] %v6070_v29 }
  0x80   : > { %4402 = vmatprep.mubr.msk.bf16.mxu1 %vm732_vm4, %v344_v19  ;;  %6837 = vst [vmem:[#allocation27_spill] sm:$0xff] %v6033_v17  ;;  %v1700_v19 = vrot.slane %v6838_v38, 5  ;;  %v2505_v42 = vsel %vm5792_vm7, %v2503_v31, %v2504_v39  ;;  %v346_v8 = vpack.c.bf16 %v6033_v17, %v6030_v6  ;;  %v1698_v39 = vsel %vm5792_vm7, %v3959_v40, %v1697_v47  ;;  %v6843_v40 = vld [vmem:[#allocation35_spill] sm:$0xff] }
  0x81   : > { %v6040_v28 = vcombine.low %v2502_v59, %v2505_v42  ;;  %v1711_v59 = vrot.slane %v6840_v3, 5  ;;  %v6061_v31 = vcombine.low %v1691_v43, %v1694_v25  ;;  %v3960_v38 = vrot.slane %v5070_v24, 9  ;;  %v6845_v3 = vld [vmem:[#allocation37_spill] sm:$0xff] }
  0x82   : > { %v1701_v23 = vsel %vm5792_vm7, %v1699_v49, %v1700_v19  ;;  %v1706_v47 = vrot.slane %v1704_v21, 4  ;;  %v1707_v42 = vrot.slane %v6843_v40, 5  ;;  %v6844_v49 = vld [vmem:[#allocation11_spill] sm:$0xff]  ;;  %v347_v43 = vpack.c.bf16 %v6070_v29, %v6067_v58 }
  0x83   : > { %4553 = vmatmul.mubr.msk.bf16.gmra.mrb[4].mxu0 %vm498_vm0, %v5997_v7  ;;  %v6064_v48 = vcombine.low %v1698_v39, %v1701_v23  ;;  %v3961_v19 = vrot.slane %v6844_v49, 9  ;;  %v1713_v9 = vrot.slane %v1711_v59, 4  ;;  %v1705_v25 = vsel %vm5792_vm7, %v3960_v38, %v1704_v21  ;;  %v6846_v39 = vld [vmem:[#allocation16_spill] sm:$0xff]  ;;  %v6847_v49 = vld [vmem:[#allocation18_spill] sm:$0xff]  ;;  %v6848_v38 = vld [vmem:[#allocation15_spill] sm:$0xff] }
  0x84   : > { %4556 = vmatprep.mubr.msk.bf16.mxu0 %vm498_vm0, %v6015_v34  ;;  %v1718_v23 = vrot.slane %v6846_v39, 5  ;;  %v6849_v39 = vld [vmem:[#allocation38_spill] sm:$0xff] }
  0x85   : > { %v1712_v24 = vsel %vm5792_vm7, %v3961_v19, %v1711_v59  ;;  %v1721_v17 = vrot.slane %v6849_v39, 5  ;;  %v6850_v59 = vld [vmem:[#allocation17_spill] sm:$0xff] }
  0x86   : > { %v3963_v19 = vrot.slane %v6850_v59, 9  ;;  %v6854_v59 = vld [vmem:[#allocation23_spill] sm:$0xff] }
  0x87   : > { %4403 = vmatmul.mubr.msk.bf16.gmra.mrb[24].mxu1 %vm732_vm4, %v345_v11  ;;  %v1714_v11 = vrot.slane %v6845_v3, 5  ;;  %v1725_v3 = vrot.slane %v6847_v49, 5  ;;  %v1739_v49 = vrot.slane %v5454_v55, 5 }
  0x88   : > { %4406 = vmatprep.mubr.msk.bf16.mxu1 %vm732_vm4, %v346_v8  ;;  %v1708_v8 = vsel %vm5792_vm7, %v1706_v47, %v1707_v42  ;;  %v3962_v47 = vrot.slane %v6848_v38, 9  ;;  %v1720_v42 = vrot.slane %v1718_v23, 4  ;;  %v6853_v38 = vld [vmem:[#allocation20_spill] sm:$0xff] }
  0x89   : > { %v1715_v40 = vsel %vm5792_vm7, %v1713_v9, %v1714_v11  ;;  %v6093_v4 = vcombine.low %v1705_v25, %v1708_v8  ;;  %v1727_v29 = vrot.slane %v1725_v3, 4  ;;  %v6851_v9 = vld [vmem:[#allocation42_spill] sm:$0xff]  ;;  %v6852_v25 = vld [vmem:[#allocation24_spill] sm:$0xff]  ;;  %v1741_v55 = vrot.slane %v1739_v49, 4 }
  0x8a   : > { %v6097_v21 = vcombine.low %v1712_v24, %v1715_v40  ;;  %v1728_v11 = vrot.slane %v6851_v9, 5  ;;  %v1732_v8 = vrot.slane %v6852_v25, 5  ;;  %v1726_v24 = vsel %vm5792_vm7, %v3963_v19, %v1725_v3  ;;  %v5071_v9 = vld [vmem:[%s6642_s2 + $0x18] sm:$0xff]  }
  0x8b   : > { %4557 = vmatmul.mubr.msk.bf16.gmra.mrb[8].mxu0 %vm498_vm0, %v6061_v31  ;;  %v1735_v3 = vrot.slane %v5659_v30, 5  ;;  %v1742_v19 = vrot.slane %v5682_v51, 5 }
  0x8c   : > { %4560 = vmatprep.mubr.msk.bf16.mxu0 %vm498_vm0, %v6064_v48  ;;  %v1729_v40 = vsel %vm5792_vm7, %v1727_v29, %v1728_v11  ;;  %v3965_v29 = vrot.slane %v5450_v62, 9 }
  0x8e   : > { %v1740_v51 = vsel %vm5792_vm7, %v3965_v29, %v1739_v49  ;;  %v6861_v29 = vld [vmem:[#allocation36_spill] sm:$0xff] }
  0x8f   : > { %4407 = vmatmul.mubr.msk.bf16.gmra.mrb[28].mxu1 %vm732_vm4, %v347_v43  ;;  %v1722_v43 = vsel %vm5792_vm7, %v1720_v42, %v1721_v17  ;;  %v6855_v17 = vld [vmem:[#allocation22_spill] sm:$0xff]  ;;  %v1734_v42 = vrot.slane %v1732_v8, 4 }
  0x90   : > { %4412 = vmatprep.mubr.msk.bf16.mxu1 %vm498_vm0, %v5945_v1  ;;  %v1719_v1 = vsel %vm5792_vm7, %v3962_v47, %v1718_v23  ;;  %v6123_v23 = vcombine.low %v1726_v24, %v1729_v40  ;;  %v3964_v47 = vrot.slane %v6855_v17, 9  ;;  %v6858_v24 = vld [vmem:[#allocation33_spill] sm:$0xff]  ;;  %v6859_v40 = vld [vmem:[#allocation30_spill] sm:$0xff] }
  0x91   : > { %v6119_v39 = vcombine.low %v1719_v1, %v1722_v43  ;;  %v1736_v62 = vsel %vm5792_vm7, %v1734_v42, %v1735_v3  ;;  %v1743_v1 = vsel %vm5792_vm7, %v1741_v55, %v1742_v19  ;;  %v6857_v43 = vld [vmem:[#allocation28_spill] sm:$0xff] }
  0x92   : > { %v1733_v30 = vsel %vm5792_vm7, %v3964_v47, %v1732_v8  ;;  %v6152_v8 = vcombine.low %v1740_v51, %v1743_v1  ;;  %v6860_v47 = vld [vmem:[#allocation54_spill] sm:$0xff]  ;;  %v6862_v19 = vld [vmem:[#allocation40_spill] sm:$0xff]  ;;  %v6867_v51 = vld [vmem:[#allocation51_spill] sm:$0xff] }
  0x93   : > { %4561 = vmatmul.mubr.msk.bf16.gmra.mrb[12].mxu0 %vm498_vm0, %v6093_v4  ;;  %v6148_v25 = vcombine.low %v1733_v30, %v1736_v62  ;;  %v1749_v42 = vrot.slane %v6860_v47, 5  ;;  %v6863_v30 = vld [vmem:[#allocation41_spill] sm:$0xff]  ;;  %v5059_v1 = vld [vmem:[%s6642_s2 + $0x40] sm:$0xff]  }
  0x94   : > { %4564 = vmatprep.mubr.msk.bf16.mxu0 %vm498_vm0, %v6097_v21  ;;  %v6864_v62 = vld [vmem:[#allocation45_spill] sm:$0xff] }
  0x95   : > { %v6871_v47 = vld [vmem:[#allocation5_spill] sm:$0xff] }
  0x97   : > { %4413 = vmatmul.mubr.msk.bf16.vlgmr.msra.gmra.mrb[0].mxu1 %vm498_vm0, %v6853_v38  ;;  %v3966_v38 = vrot.slane %v6859_v40, 9  ;;  %v6868_v40 = vld [vmem:[#allocation3_spill] sm:$0xff] }
  0x98   : > { %4416 = vmatprep.mubr.msk.bf16.mxu1 %vm498_vm0, %v6854_v59  ;;  %4445 = vmatpush3.bf16.msra.mxu1 %v5725_v61  ;;  %v6856_v61 = vld [vmem:[#allocation31_spill] sm:$0xff] }
  0x99   : > { %4730 = vmatprep.subr.bf16.mxu1 %v5071_v9  ;;  %v1746_v11 = vrot.slane %v6856_v61, 5  ;;  %v6865_v61 = vld [vmem:[#allocation2_spill] sm:$0xff] }
  0x9b   : > { %4565 = vmatmul.mubr.msk.bf16.gmra.mrb[16].mxu0 %vm498_vm0, %v6119_v39  ;;  %v1748_v17 = vrot.slane %v1746_v11, 4  ;;  %v1747_v49 = vsel %vm5792_vm7, %v3966_v38, %v1746_v11  ;;  %v6866_v11 = vld [vmem:[#allocation49_spill] sm:$0xff]  ;;  %v6869_v38 = vld [vmem:[#allocation4_spill] sm:$0xff] }
  0x9c   : > { %4568 = vmatprep.mubr.msk.bf16.mxu0 %vm498_vm0, %v6123_v23 }
  0x9d   : > { %v1750_v3 = vsel %vm5792_vm7, %v1748_v17, %v1749_v42  ;;  %v6870_v17 = vld [vmem:[#allocation55_spill] sm:$0xff]  ;;  %v6872_v42 = vld [vmem:[#allocation9_spill] sm:$0xff] }
  0x9e   : > { %v6166_v55 = vcombine.low %v1747_v49, %v1750_v3  ;;  %v6874_v49 = vld [vmem:[#allocation13_spill] sm:$0xff]  ;;  %v6875_v3 = vcombine.low %v6001_v0, %v6027_v63  ;;  %v6879_v0 = vld [vmem:[#allocation26_spill] sm:$0xff] }
  0x9f   : > { %4417 = vmatmul.mubr.msk.bf16.gmra.mrb[4].mxu1 %vm498_vm0, %v6857_v43  ;;  %v6880_v63 = vld [vmem:[#allocation29_spill] sm:$0xff] }
  0xa0   : > { %4420 = vmatprep.mubr.msk.bf16.mxu1 %vm498_vm0, %v6858_v24 }
  0xa3   : > { %4569 = vmatmul.mubr.msk.bf16.gmra.mrb[20].mxu0 %vm498_vm0, %v6148_v25 }
  0xa4   : > { %4572 = vmatprep.mubr.msk.bf16.mxu0 %vm498_vm0, %v6152_v8 }
  0xa7   : > { %4421 = vmatmul.mubr.msk.bf16.gmra.mrb[8].mxu1 %vm498_vm0, %v6861_v29 }
  0xa8   : > { %4424 = vmatprep.mubr.msk.bf16.mxu1 %vm498_vm0, %v6862_v19 }
  0xab   : > { %4573 = vmatmul.mubr.msk.bf16.gmra.mrb[24].mxu0 %vm498_vm0, %v6166_v55 }
  0xac   : > { %4576 = vmatprep.mubr.msk.bf16.mxu0 %vm498_vm0, %v6023_v18 }
  0xaf   : > { %4425 = vmatmul.mubr.msk.bf16.gmra.mrb[12].mxu1 %vm498_vm0, %v6863_v30 }
  0xb0   : > { %4428 = vmatprep.mubr.msk.bf16.mxu1 %vm498_vm0, %v6864_v62 }
  0xb3   : > { %4577 = vmatmul.mubr.msk.bf16.gmra.mrb[28].mxu0 %vm498_vm0, %v6040_v28 }
  0xb4   : > { %4582 = vmatprep.mubr.msk.bf16.mxu0 %vm498_vm0, %v6865_v61  ;;  %v6876_v61 = vld [vmem:[#allocation14_spill] sm:$0xff] }
  0xb7   : > { %4429 = vmatmul.mubr.msk.bf16.gmra.mrb[16].mxu1 %vm498_vm0, %v6866_v11 }
  0xb8   : > { %4432 = vmatprep.mubr.msk.bf16.mxu1 %vm498_vm0, %v6867_v51 }
  0xbb   : > { %4583 = vmatmul.mubr.msk.bf16.vlgmr.msra.gmra.mrb[0].mxu0 %vm498_vm0, %v6868_v40  ;;  %v6877_v40 = vld [vmem:[#allocation19_spill] sm:$0xff] }
  0xbc   : > { %4615 = vmatpush3.bf16.msra.mxu0 %v5969_v46  ;;  %4586 = vmatprep.mubr.msk.bf16.mxu0 %vm498_vm0, %v6869_v38  ;;  %v6873_v46 = vld [vmem:[#allocation10_spill] sm:$0xff]  ;;  %v6878_v38 = vld [vmem:[#allocation21_spill] sm:$0xff] }
  0xbd   : > { %4648 = vmatprep.subr.bf16.mxu0 %v5059_v1 }
  0xbf   : > { %4433 = vmatmul.mubr.msk.bf16.gmra.mrb[20].mxu1 %vm498_vm0, %v6870_v17 }
  0xc0   : > { %4436 = vmatprep.mubr.msk.bf16.mxu1 %vm498_vm0, %v5798_v36 }
  0xc3   : > { %4587 = vmatmul.mubr.msk.bf16.gmra.mrb[4].mxu0 %vm498_vm0, %v6871_v47  ;;  %v6245_v47 = vld [vmem:[%s5148_s14 + $0xcc] sm:$0xf] }
  0xc4   : > { %4590 = vmatprep.mubr.msk.bf16.mxu0 %vm498_vm0, %v6872_v42  ;;  %v6248_v42 = vld [vmem:[%s5148_s14 + $0xd0] sm:$0xf] }
  0xc5   : > { %v3159_v37 = vrot.slane %v6248_v42, 5 }
  0xc7   : > { %4437 = vmatmul.mubr.msk.bf16.gmra.mrb[24].mxu1 %vm498_vm0, %v5801_v35 }
  0xc8   : > { %4440 = vmatprep.mubr.msk.bf16.mxu1 %vm498_vm0, %v5868_v2 }
  0xcb   : > { %4591 = vmatmul.mubr.msk.bf16.gmra.mrb[8].mxu0 %vm498_vm0, %v6873_v46  ;;  %v4066_v46 = vcombine.low %v6245_v47, %v6248_v42 }
  0xcc   : > { %4594 = vmatprep.mubr.msk.bf16.mxu0 %vm498_vm0, %v6874_v49 }
  0xcf   : > { %4441 = vmatmul.mubr.msk.bf16.gmra.mrb[28].mxu1 %vm498_vm0, %v5871_v53 }
  0xd0   : > { %4446 = vmatprep.mubr.msk.bf16.mxu1 %vm498_vm0, %v6875_v3 }
  0xd3   : > { %4595 = vmatmul.mubr.msk.bf16.gmra.mrb[12].mxu0 %vm498_vm0, %v6876_v61 }
  0xd4   : > { %4598 = vmatprep.mubr.msk.bf16.mxu0 %vm498_vm0, %v6877_v40 }
  0xd7   : > { %4447 = vmatmul.mubr.msk.bf16.vlgmr.msra.gmra.mrb[0].mxu1 %vm498_vm0, %v5849_v56  ;;  %v6881_v56 = vld [vmem:[#allocation34_spill] sm:$0xff] }
  0xd8   : > { %4450 = vmatprep.mubr.msk.bf16.mxu1 %vm498_vm0, %v5860_v52  ;;  %4731 = vmatpush3.bf16.msra.mxu1 %v5071_v9  ;;  %v6882_v9 = vld [vmem:[#allocation43_spill] sm:$0xff] }
  0xdb   : > { %4599 = vmatmul.mubr.msk.bf16.gmra.mrb[16].mxu0 %vm498_vm0, %v6878_v38 }
  0xdc   : > { %4602 = vmatprep.mubr.msk.bf16.mxu0 %vm498_vm0, %v6879_v0 }
  0xdf   : > { %4451 = vmatmul.mubr.msk.bf16.gmra.mrb[4].mxu1 %vm498_vm0, %v5958_v15 }
  0xe0   : > { %4454 = vmatprep.mubr.msk.bf16.mxu1 %vm498_vm0, %v5997_v7 }
  0xe3   : > { %4603 = vmatmul.mubr.msk.bf16.gmra.mrb[20].mxu0 %vm498_vm0, %v6880_v63 }
  0xe4   : > { %4606 = vmatprep.mubr.msk.bf16.mxu0 %vm498_vm0, %v6881_v56 }
  0xe7   : > { %4455 = vmatmul.mubr.msk.bf16.gmra.mrb[8].mxu1 %vm498_vm0, %v6015_v34 }
  0xe8   : > { %4458 = vmatprep.mubr.msk.bf16.mxu1 %vm498_vm0, %v6061_v31 }
  0xeb   : > { %4607 = vmatmul.mubr.msk.bf16.gmra.mrb[24].mxu0 %vm498_vm0, %v6882_v9 }
  0xec   : > { %4610 = vmatprep.mubr.msk.bf16.mxu0 %vm498_vm0, %v6006_v27 }
  0xef   : > { %4459 = vmatmul.mubr.msk.bf16.gmra.mrb[12].mxu1 %vm498_vm0, %v6064_v48 }
  0xf0   : > { %4462 = vmatprep.mubr.msk.bf16.mxu1 %vm498_vm0, %v6093_v4 }
  0xf3   : > { %4611 = vmatmul.mubr.msk.bf16.gmra.mrb[28].mxu0 %vm498_vm0, %v4066_v46 }
  0xf4   : > { %4616 = vmatprep.mubr.msk.bf16.mxu0 %vm498_vm0, %v6854_v59  ;;  %v2925_v59 = vshrl.u32 %v6245_v47, 16 }
  0xf7   : > { %4463 = vmatmul.mubr.msk.bf16.gmra.mrb[16].mxu1 %vm498_vm0, %v6097_v21 }
  0xf8   : > { %4466 = vmatprep.mubr.msk.bf16.mxu1 %vm498_vm0, %v6119_v39 }
  0xfb   : > { %4617 = vmatmul.mubr.msk.bf16.vlgmr.msra.gmra.mrb[0].mxu0 %vm498_vm0, %v6857_v43  ;;  %v2928_v43 = vshll.u32 %v6245_v47, 16 }
  0xfc   : > { %4649 = vmatpush3.bf16.msra.mxu0 %v5059_v1  ;;  %4620 = vmatprep.mubr.msk.bf16.mxu0 %vm498_vm0, %v6858_v24  ;;  %v2938_v24 = vshrl.u32 %v6248_v42, 16 }
  0xff   : > { %4467 = vmatmul.mubr.msk.bf16.gmra.mrb[20].mxu1 %vm498_vm0, %v6123_v23 }
 0x100   : > { %4470 = vmatprep.mubr.msk.bf16.mxu1 %vm498_vm0, %v6148_v25 }
 0x103   : > { %4621 = vmatmul.mubr.msk.bf16.gmra.mrb[4].mxu0 %vm498_vm0, %v6861_v29  ;;  %v2934_v29 = vshll.u32 %v6248_v42, 16 }
 0x104   : > { %4624 = vmatprep.mubr.msk.bf16.mxu0 %vm498_vm0, %v6862_v19  ;;  %v2927_v19 = vrot.slane %v2925_v59, 4 }
 0x107   : > { %4471 = vmatmul.mubr.msk.bf16.gmra.mrb[24].mxu1 %vm498_vm0, %v6152_v8 }
 0x108   : > { %4474 = vmatprep.mubr.msk.bf16.mxu1 %vm498_vm0, %v6166_v55 }
 0x10b   : > { %4625 = vmatmul.mubr.msk.bf16.gmra.mrb[8].mxu0 %vm498_vm0, %v6863_v30  ;;  %v2930_v30 = vrot.slane %v2928_v43, 5 }
 0x10c   : > { %4628 = vmatprep.mubr.msk.bf16.mxu0 %vm498_vm0, %v6864_v62  ;;  %v2936_v62 = vrot.slane %v2934_v29, 5 }
 0x10f   : > { %4475 = vmatmul.mubr.msk.bf16.gmra.mrb[28].mxu1 %vm498_vm0, %v6023_v18 }
 0x110   : > { %4496 = vmatprep.mubr.msk.bf16.mxu1 %vm498_vm0, %v6876_v61 }
 0x113   : > { %4629 = vmatmul.mubr.msk.bf16.gmra.mrb[12].mxu0 %vm498_vm0, %v6866_v11  ;;  %v2940_v11 = vrot.slane %v2938_v24, 4 }
 0x114   : > { %4632 = vmatprep.mubr.msk.bf16.mxu0 %vm498_vm0, %v6867_v51  ;;  %v409_v51 = vld [vmem:[%s5148_s14 + $0xd4] sm:$0x1] }
 0x115   : > { %v2941_v1 = vor.u32 %v2940_v11, %v2936_v62 }
 0x117   : > { %4497 = vmatmul.mubr.msk.bf16.vlgmr.msra.gmra.mrb[16].mxu1 %vm498_vm0, %v6877_v40  ;;  %v2942_v3 = vrot.slane %v2941_v1, 4 }
 0x118   : > { %4500 = vmatprep.mubr.msk.bf16.mxu1 %vm498_vm0, %v6878_v38 }
 0x11b   : > { %4633 = vmatmul.mubr.msk.bf16.gmra.mrb[16].mxu0 %vm498_vm0, %v6870_v17  ;;  %v2944_v17 = vshll.u32 %v409_v51, 16 }
 0x11c   : > { %4636 = vmatprep.mubr.msk.bf16.mxu0 %vm498_vm0, %v5798_v36  ;;  %v2931_v36 = vor.u32 %v2930_v30, %v2927_v19 }
 0x11d   : > { %v2946_v61 = vrot.slane %v2944_v17, 5 }
 0x11e   : > { %v2932_v49 = vrot.slane %v2931_v36, 4 }
 0x11f   : > { %4501 = vmatmul.mubr.msk.bf16.gmra.mrb[20].mxu1 %vm498_vm0, %v6879_v0 }
 0x120   : > { %4504 = vmatprep.mubr.msk.bf16.mxu1 %vm498_vm0, %v6880_v63 }
 0x123   : > { %4637 = vmatmul.mubr.msk.bf16.gmra.mrb[20].mxu0 %vm498_vm0, %v5801_v35  ;;  %v2937_v35 = vsel %vm5327_vm3, %v2932_v49, %v2936_v62 }
 0x124   : > { %4640 = vmatprep.mubr.msk.bf16.mxu0 %vm498_vm0, %v5868_v2  ;;  %v2947_v2 = vsel %vm5327_vm3, %v2942_v3, %v2946_v61 }
 0x125   : > { %v4086_v40 = vcombine.low %v2937_v35, %v2947_v2 }
 0x127   : > { %4505 = vmatmul.mubr.msk.bf16.gmra.mrb[24].mxu1 %vm498_vm0, %v6881_v56 }
 0x128   : > { %4508 = vmatprep.mubr.msk.bf16.mxu1 %vm498_vm0, %v6882_v9 }
 0x12b   : > { %4641 = vmatmul.mubr.msk.bf16.gmra.mrb[24].mxu0 %vm498_vm0, %v5871_v53  ;;  %v3161_v53 = vrot.slane %v3159_v37, 4 }
 0x12c   : > { %4644 = vmatprep.mubr.msk.bf16.mxu0 %vm498_vm0, %v5902_v14  ;;  %v3162_v14 = vrot.slane %v409_v51, 5 }
 0x12f   : > { %4509 = vmatmul.mubr.msk.bf16.gmra.mrb[28].mxu1 %vm498_vm0, %v6006_v27 }
 0x133   : > { %4645 = vmatmul.mubr.msk.bf16.gmra.mrb[28].mxu0 %vm498_vm0, %v4086_v40 }
 0x134   : > { %4650 = vmatprep.mubr.msk.bf16.mxu0 %vm498_vm0, %v5860_v52  ;;  %v4104_v52 = vrot.slane %v6245_v47, 9 }
 0x13b   : > { %4651 = vmatmul.mubr.msk.bf16.vlgmr.msra.gmra.mrb[0].mxu0 %vm498_vm0, %v5958_v15  ;;  %v3160_v15 = vsel %vm5792_vm7, %v4104_v52, %v3159_v37 }
 0x13c   : > { %4654 = vmatprep.mubr.msk.bf16.mxu0 %vm498_vm0, %v5997_v7  ;;  %v3163_v7 = vsel %vm5792_vm7, %v3161_v53, %v3162_v14  ;;  %v6439_v53 = vld [vmem:[%s6644_s4] ss:$0 sm:$0xff] }
 0x13d   : > { %v4107_v27 = vcombine.low %v3160_v15, %v3163_v7  ;;  %v6444_v7 = vld [vmem:[%s6645_s5] ss:$0 sm:$0xff] }
 0x143   : > { %4655 = vmatmul.mubr.msk.bf16.gmra.mrb[4].mxu0 %vm498_vm0, %v6015_v34  ;;  %v5060_v34 = vld [vmem:[%s6646_s6] sm:$0xff]  }
 0x144   : > { %4658 = vmatprep.mubr.msk.bf16.mxu0 %vm498_vm0, %v6061_v31  ;;  %4682 = vmatprep.subr.bf16.mxu1 %v5060_v34  ;;  %v5065_v31 = vld [vmem:[%s6646_s6 + $0x28] sm:$0xff]  }
 0x145   : > { %4683 = vmatpush3.bf16.msra.mxu1 %v5060_v34 }
 0x14b   : > { %4659 = vmatmul.mubr.msk.bf16.gmra.mrb[8].mxu0 %vm498_vm0, %v6064_v48  ;;  %v5066_v48 = vld [vmem:[%s6646_s6 + $0x30] sm:$0xff]  }
 0x14c   : > { %4662 = vmatprep.mubr.msk.bf16.mxu0 %vm498_vm0, %v6093_v4  ;;  %v5062_v4 = vld [vmem:[%s6646_s6 + $0x10] sm:$0xff]  }
 0x153   : > { %4663 = vmatmul.mubr.msk.bf16.gmra.mrb[12].mxu0 %vm498_vm0, %v6097_v21  ;;  %v5067_v21 = vld [vmem:[%s6646_s6 + $0x38] sm:$0xff]  }
 0x154   : > { %4666 = vmatprep.mubr.msk.bf16.mxu0 %vm498_vm0, %v6119_v39 }
 0x15b   : > { %4667 = vmatmul.mubr.msk.bf16.gmra.mrb[16].mxu0 %vm498_vm0, %v6123_v23 }
 0x15c   : > { %4670 = vmatprep.mubr.msk.bf16.mxu0 %vm498_vm0, %v6148_v25 }
 0x163   : > { %4671 = vmatmul.mubr.msk.bf16.gmra.mrb[20].mxu0 %vm498_vm0, %v6152_v8 }
 0x164   : > { %4674 = vmatprep.mubr.msk.bf16.mxu0 %vm498_vm0, %v6166_v55 }
 0x16b   : > { %4675 = vmatmul.mubr.msk.bf16.gmra.mrb[24].mxu0 %vm498_vm0, %v6023_v18  ;;  %v5061_v18 = vld [vmem:[%s6646_s6 + $0x8] sm:$0xff]  }
 0x16c   : > { %4678 = vmatprep.mubr.msk.bf16.mxu0 %vm498_vm0, %v6040_v28  ;;  %4684 = vmatprep.subr.bf16.mxu1 %v5061_v18  ;;  %v5064_v28 = vld [vmem:[%s6646_s6 + $0x20] sm:$0xff]  }
 0x16d   : > { %4685 = vmatpush3.bf16.msra.mxu1 %v5061_v18 }
 0x16e   : > { %4686 = vmatprep.subr.bf16.mxu1 %v5062_v4 }
 0x171   : > { %4687 = vmatpush3.bf16.msra.mxu1 %v5062_v4 }
 0x172   : > { %4688 = vmatprep.subr.bf16.mxu1 %v5063_v45 }
 0x173   : > { %4679 = vmatmul.mubr.msk.bf16.gmra.mrb[28].mxu0 %vm498_vm0, %v4107_v27 }
 0x175   : > { %4689 = vmatpush3.bf16.msra.mxu1 %v5063_v45 }
 0x176   : > { %4690 = vmatprep.subr.bf16.mxu1 %v5064_v28 }
 0x179   : > { %4691 = vmatpush3.bf16.msra.mxu1 %v5064_v28 }
 0x17a   : > { %4692 = vmatprep.subr.bf16.mxu1 %v5065_v31 }
 0x17d   : > { %4693 = vmatpush3.bf16.msra.mxu1 %v5065_v31 }
 0x17e   : > { %4694 = vmatprep.subr.bf16.mxu1 %v5066_v48 }
 0x181   : > { %4695 = vmatpush3.bf16.msra.mxu1 %v5066_v48 }
 0x182   : > { %4696 = vmatprep.subr.bf16.mxu1 %v5067_v21 }
 0x185   : > { %4697 = vmatpush3.bf16.msra.mxu1 %v5067_v21 }
 0x1aa   : > { %v4448_v39 = vpop.f32.mrb[0].mxu1 }
 0x1ab   : > { %v1897_v23 = vpop.f32.mrb[1].mxu1 }
 0x1ac   : > { %v4449_v25 = vpop.f32.mrb[2].mxu1 }
 0x1ad   : > { %v1900_v8 = vpop.f32.mrb[3].mxu1 }
 0x1b2   : > { %v4452_v55 = vpop.f32.mrb[4].mxu1 }
 0x1b3   : > { %v1913_v38 = vpop.f32.mrb[5].mxu1 }
 0x1b4   : > { %v4453_v0 = vpop.f32.mrb[6].mxu1 }
 0x1b5   : > { %v1916_v63 = vpop.f32.mrb[7].mxu1 }
 0x1ba   : > { %v6388_v56 = vpop.f32.mrb[8].mxu1 }
 0x1bb   : > { %v6390_v9 = vpop.f32.mrb[9].mxu1 }
 0x1bc   : > { %v6392_v47 = vpop.f32.mrb[10].mxu1 }
 0x1bd   : > { %v6394_v42 = vpop.f32.mrb[11].mxu1 }
 0x1c2   : > { %v6396_v46 = vpop.f32.mrb[12].mxu1 }
 0x1c3   : > { %v6398_v59 = vpop.f32.mrb[13].mxu1 }
 0x1c4   : > { %v6400_v43 = vpop.f32.mrb[14].mxu1 }
 0x1c5   : > { %v6402_v24 = vpop.f32.mrb[15].mxu1 }
 0x1ea   : > { %v6404_v29 = vpop.f32.mrb[16].mxu1 }
 0x1eb   : > { %v6406_v19 = vpop.f32.mrb[17].mxu1 }
 0x1ec   : > { %v6408_v30 = vpop.f32.mrb[18].mxu1 }
 0x1ed   : > { %v6410_v62 = vpop.f32.mrb[19].mxu1 }
 0x1f2   : > { %v6412_v11 = vpop.f32.mrb[20].mxu1 }
 0x1f3   : > { %v6414_v51 = vpop.f32.mrb[21].mxu1 }
 0x1f4   : > { %v6416_v36 = vpop.f32.mrb[22].mxu1 }
 0x1f5   : > { %v6418_v1 = vpop.f32.mrb[23].mxu1 }
 0x1fa   : > { %v6420_v17 = vpop.f32.mrb[24].mxu1 }
 0x1fb   : > { %v6422_v49 = vpop.f32.mrb[25].mxu1 }
 0x1fc   : > { %v6424_v3 = vpop.f32.mrb[26].mxu1 }
 0x1fd   : > { %v6426_v61 = vpop.f32.mrb[27].mxu1 }
 0x202   : > { %v6428_v35 = vpop.f32.mrb[28].mxu1 }
 0x203   : > { %v6430_v2 = vpop.f32.mrb[29].mxu1 }
 0x204   : > { %v6432_v40 = vpop.f32.mrb[30].mxu1 }
 0x205   : > { %v6434_v37 = vpop.f32.mrb[31].mxu1 }
 0x20e   : > { %v4652_v52 = vpop.f32.mrb[0].mxu0 }
 0x20f   : > { %v4732_v14 = vadd.f32 %v4652_v52, %v4448_v39  ;;  %v3213_v15 = vpop.f32.mrb[1].mxu0 }
 0x210   : > { %v4733_v27 = vadd.f32 %v3213_v15, %v1897_v23  ;;  %v4653_v34 = vpop.f32.mrb[2].mxu0 }
 0x211   : > { %v3381_v18 = vmul.f32 %v4732_v14, %v6439_v53  ;;  %v4734_v4 = vadd.f32 %v4653_v34, %v4449_v25  ;;  %v3216_v45 = vpop.f32.mrb[3].mxu0 }
 0x212   : > { %v3379_v28 = vmul.f32 %v4733_v27, %v6439_v53  ;;  %v4735_v31 = vadd.f32 %v3216_v45, %v1900_v8 }
 0x213   : > { %v3420_v48 = vadd.f32 %v6444_v7, %v3381_v18  ;;  %v3382_v21 = vmul.f32 %v4734_v4, %v6439_v53 }
 0x214   : > { %v3418_v39 = vadd.f32 %v6444_v7, %v3379_v28  ;;  %v3380_v52 = vmul.f32 %v4735_v31, %v6439_v53 }
 0x215   : > { %v3421_v6 = vadd.f32 %v6444_v7, %v3382_v21  ;;  %v3452_v58 = vmax.f32 %v3420_v48, 0.0 }
 0x216   : > { %v3419_v23 = vadd.f32 %v6444_v7, %v3380_v52  ;;  %v4656_v15 = vpop.f32.mrb[4].mxu0  ;;  %v3450_v41 = vmax.f32 %v3418_v39, 0.0 }
 0x217   : > { %v3453_v14 = vmax.f32 %v3421_v6, 0.0  ;;  %v4736_v25 = vadd.f32 %v4656_v15, %v4452_v55  ;;  %v3229_v34 = vpop.f32.mrb[5].mxu0 }
 0x218   : > { %v3451_v27 = vmax.f32 %v3419_v23, 0.0  ;;  %v4737_v8 = vadd.f32 %v3229_v34, %v1913_v38  ;;  %v4657_v45 = vpop.f32.mrb[6].mxu0 }
 0x219   : > { %v3483_v18 = vpack.c.bf16 %v3453_v14, %v3452_v58  ;;  %v3385_v4 = vmul.f32 %v4736_v25, %v6439_v53  ;;  %v4738_v60 = vadd.f32 %v4657_v45, %v4453_v0  ;;  %v3232_v28 = vpop.f32.mrb[7].mxu0 }
 0x21a   : > { %v3383_v31 = vmul.f32 %v4737_v8, %v6439_v53  ;;  %v4739_v26 = vadd.f32 %v3232_v28, %v1916_v63  ;;  %v3482_v21 = vpack.c.bf16 %v3451_v27, %v3450_v41 }
 0x21b   : > { %v3424_v52 = vadd.f32 %v6444_v7, %v3385_v4  ;;  %v3386_v48 = vmul.f32 %v4738_v60, %v6439_v53 }
 0x21c   : > { %v3422_v6 = vadd.f32 %v6444_v7, %v3383_v31  ;;  %v3384_v55 = vmul.f32 %v4739_v26, %v6439_v53  ;;  %4698 = vmatprep.mubr.bf16.mxu1 %v3482_v21 }
 0x21d   : > { %v3425_v38 = vadd.f32 %v6444_v7, %v3386_v48  ;;  %4699 = vmatmul.mubr.bf16.vlgmr.msra.gmra.mrb[32].mxu1 %v3483_v18  ;;  %v3456_v39 = vmax.f32 %v3424_v52, 0.0 }
 0x21e   : > { %v3423_v58 = vadd.f32 %v6444_v7, %v3384_v55  ;;  %v4660_v0 = vpop.f32.mrb[8].mxu0  ;;  %v3454_v15 = vmax.f32 %v3422_v6, 0.0 }
 0x21f   : > { %v3457_v23 = vmax.f32 %v3425_v38, 0.0  ;;  %v4740_v63 = vadd.f32 %v4660_v0, %v6388_v56  ;;  %v3245_v41 = vpop.f32.mrb[9].mxu0 }
 0x220   : > { %v3455_v14 = vmax.f32 %v3423_v58, 0.0  ;;  %v4741_v60 = vadd.f32 %v3245_v41, %v6390_v9  ;;  %v4661_v25 = vpop.f32.mrb[10].mxu0 }
 0x221   : > { %v3389_v34 = vmul.f32 %v4740_v63, %v6439_v53  ;;  %v4742_v26 = vadd.f32 %v4661_v25, %v6392_v47  ;;  %v3248_v27 = vpop.f32.mrb[11].mxu0  ;;  %v3485_v8 = vpack.c.bf16 %v3457_v23, %v3456_v39 }
 0x222   : > { %v3387_v45 = vmul.f32 %v4741_v60, %v6439_v53  ;;  %v4743_v18 = vadd.f32 %v3248_v27, %v6394_v42  ;;  %v3484_v4 = vpack.c.bf16 %v3455_v14, %v3454_v15 }
 0x223   : > { %v3428_v28 = vadd.f32 %v6444_v7, %v3389_v34  ;;  %v3390_v56 = vmul.f32 %v4742_v26, %v6439_v53 }
 0x224   : > { %v3426_v31 = vadd.f32 %v6444_v7, %v3387_v45  ;;  %v3388_v9 = vmul.f32 %v4743_v18, %v6439_v53  ;;  %4702 = vmatprep.mubr.bf16.mxu1 %v3484_v4 }
 0x225   : > { %v3429_v21 = vadd.f32 %v6444_v7, %v3390_v56  ;;  %4703 = vmatmul.mubr.bf16.gmra.mrb[36].mxu1 %v3485_v8  ;;  %v3460_v48 = vmax.f32 %v3428_v28, 0.0 }
 0x226   : > { %v3427_v47 = vadd.f32 %v6444_v7, %v3388_v9  ;;  %v4664_v52 = vpop.f32.mrb[12].mxu0  ;;  %v3458_v38 = vmax.f32 %v3426_v31, 0.0 }
 0x227   : > { %v3461_v6 = vmax.f32 %v3429_v21, 0.0  ;;  %v4744_v42 = vadd.f32 %v4664_v52, %v6396_v46  ;;  %v3261_v55 = vpop.f32.mrb[13].mxu0 }
 0x228   : > { %v3459_v58 = vmax.f32 %v3427_v47, 0.0  ;;  %v4745_v0 = vadd.f32 %v3261_v55, %v6398_v59  ;;  %v4665_v39 = vpop.f32.mrb[14].mxu0 }
 0x229   : > { %v3393_v23 = vmul.f32 %v4744_v42, %v6439_v53  ;;  %v4746_v63 = vadd.f32 %v4665_v39, %v6400_v43  ;;  %v3264_v41 = vpop.f32.mrb[15].mxu0  ;;  %v3487_v15 = vpack.c.bf16 %v3461_v6, %v3460_v48 }
 0x22a   : > { %v3391_v14 = vmul.f32 %v4745_v0, %v6439_v53  ;;  %v4747_v60 = vadd.f32 %v3264_v41, %v6402_v24  ;;  %v3486_v25 = vpack.c.bf16 %v3459_v58, %v3458_v38 }
 0x22b   : > { %v3432_v34 = vadd.f32 %v6444_v7, %v3393_v23  ;;  %v3394_v46 = vmul.f32 %v4746_v63, %v6439_v53 }
 0x22c   : > { %v3430_v26 = vadd.f32 %v6444_v7, %v3391_v14  ;;  %v3392_v59 = vmul.f32 %v4747_v60, %v6439_v53  ;;  %4706 = vmatprep.mubr.bf16.mxu1 %v3486_v25 }
 0x22d   : > { %v3433_v27 = vadd.f32 %v6444_v7, %v3394_v46  ;;  %4707 = vmatmul.mubr.bf16.gmra.mrb[40].mxu1 %v3487_v15  ;;  %v3464_v45 = vmax.f32 %v3432_v34, 0.0 }
 0x22e   : > { %v3431_v43 = vadd.f32 %v6444_v7, %v3392_v59  ;;  %v4668_v8 = vpop.f32.mrb[16].mxu0  ;;  %v3462_v28 = vmax.f32 %v3430_v26, 0.0 }
 0x22f   : > { %v3465_v18 = vmax.f32 %v3433_v27, 0.0  ;;  %v4748_v24 = vadd.f32 %v4668_v8, %v6404_v29  ;;  %v3277_v4 = vpop.f32.mrb[17].mxu0 }
 0x230   : > { %v3463_v56 = vmax.f32 %v3431_v43, 0.0  ;;  %v4749_v31 = vadd.f32 %v3277_v4, %v6406_v19  ;;  %v4669_v9 = vpop.f32.mrb[18].mxu0 }
 0x231   : > { %v3397_v21 = vmul.f32 %v4748_v24, %v6439_v53  ;;  %v4750_v47 = vadd.f32 %v4669_v9, %v6408_v30  ;;  %v3280_v52 = vpop.f32.mrb[19].mxu0  ;;  %v3489_v48 = vpack.c.bf16 %v3465_v18, %v3464_v45 }
 0x232   : > { %v3395_v6 = vmul.f32 %v4749_v31, %v6439_v53  ;;  %v4751_v42 = vadd.f32 %v3280_v52, %v6410_v62  ;;  %v3488_v55 = vpack.c.bf16 %v3463_v56, %v3462_v28 }
 0x233   : > { %v3436_v38 = vadd.f32 %v6444_v7, %v3397_v21  ;;  %v3398_v29 = vmul.f32 %v4750_v47, %v6439_v53 }
 0x234   : > { %v3434_v58 = vadd.f32 %v6444_v7, %v3395_v6  ;;  %v3396_v19 = vmul.f32 %v4751_v42, %v6439_v53  ;;  %4710 = vmatprep.mubr.bf16.mxu1 %v3488_v55 }
 0x235   : > { %v3437_v0 = vadd.f32 %v6444_v7, %v3398_v29  ;;  %4711 = vmatmul.mubr.bf16.gmra.mrb[44].mxu1 %v3489_v48  ;;  %v3468_v23 = vmax.f32 %v3436_v38, 0.0 }
 0x236   : > { %v3435_v30 = vadd.f32 %v6444_v7, %v3396_v19  ;;  %v4672_v39 = vpop.f32.mrb[20].mxu0  ;;  %v3466_v15 = vmax.f32 %v3434_v58, 0.0 }
 0x237   : > { %v3469_v63 = vmax.f32 %v3437_v0, 0.0  ;;  %v4752_v62 = vadd.f32 %v4672_v39, %v6412_v11  ;;  %v3293_v41 = vpop.f32.mrb[21].mxu0 }
 0x238   : > { %v3467_v14 = vmax.f32 %v3435_v30, 0.0  ;;  %v4753_v60 = vadd.f32 %v3293_v41, %v6414_v51  ;;  %v4673_v25 = vpop.f32.mrb[22].mxu0 }
 0x239   : > { %v3401_v34 = vmul.f32 %v4752_v62, %v6439_v53  ;;  %v4754_v46 = vadd.f32 %v4673_v25, %v6416_v36  ;;  %v3296_v26 = vpop.f32.mrb[23].mxu0  ;;  %v3491_v59 = vpack.c.bf16 %v3469_v63, %v3468_v23 }
 0x23a   : > { %v3399_v27 = vmul.f32 %v4753_v60, %v6439_v53  ;;  %v4755_v43 = vadd.f32 %v3296_v26, %v6418_v1  ;;  %v3490_v8 = vpack.c.bf16 %v3467_v14, %v3466_v15 }
 0x23b   : > { %v3440_v45 = vadd.f32 %v6444_v7, %v3401_v34  ;;  %v3402_v11 = vmul.f32 %v4754_v46, %v6439_v53 }
 0x23c   : > { %v3438_v18 = vadd.f32 %v6444_v7, %v3399_v27  ;;  %v3400_v51 = vmul.f32 %v4755_v43, %v6439_v53  ;;  %4714 = vmatprep.mubr.bf16.mxu1 %v3490_v8 }
 0x23d   : > { %v3441_v24 = vadd.f32 %v6444_v7, %v3402_v11  ;;  %4715 = vmatmul.mubr.bf16.gmra.mrb[48].mxu1 %v3491_v59  ;;  %v3472_v28 = vmax.f32 %v3440_v45, 0.0 }
 0x23e   : > { %v3439_v36 = vadd.f32 %v6444_v7, %v3400_v51  ;;  %v4676_v4 = vpop.f32.mrb[24].mxu0  ;;  %v3470_v9 = vmax.f32 %v3438_v18, 0.0 }
 0x23f   : > { %v3473_v56 = vmax.f32 %v3441_v24, 0.0  ;;  %v4756_v1 = vadd.f32 %v4676_v4, %v6420_v17  ;;  %v3309_v31 = vpop.f32.mrb[25].mxu0 }
 0x240   : > { %v3471_v21 = vmax.f32 %v3439_v36, 0.0  ;;  %v4757_v47 = vadd.f32 %v3309_v31, %v6422_v49  ;;  %v4677_v52 = vpop.f32.mrb[26].mxu0 }
 0x241   : > { %v3405_v48 = vmul.f32 %v4756_v1, %v6439_v53  ;;  %v4758_v6 = vadd.f32 %v4677_v52, %v6424_v3  ;;  %v3312_v42 = vpop.f32.mrb[27].mxu0  ;;  %v3493_v55 = vpack.c.bf16 %v3473_v56, %v3472_v28  ;;  %v5073_v1 = vld [vmem:[%s5579_s9] sm:$0xff] }
 0x242   : > { %v3403_v38 = vmul.f32 %v4757_v47, %v6439_v53  ;;  %v4759_v29 = vadd.f32 %v3312_v42, %v6426_v61  ;;  %v3492_v58 = vpack.c.bf16 %v3471_v21, %v3470_v9  ;;  %v6883_v21 = vld [vmem:[#allocation44_spill] sm:$0xff] }
 0x243   : > { %v3444_v19 = vadd.f32 %v6444_v7, %v3405_v48  ;;  %v3406_v17 = vmul.f32 %v4758_v6, %v6439_v53  ;;  %v6884_v48 = vld [vmem:[#allocation39_spill] sm:$0xff] }
 0x244   : > { %v3442_v0 = vadd.f32 %v6444_v7, %v3403_v38  ;;  %v3404_v49 = vmul.f32 %v4759_v29, %v6439_v53  ;;  %4718 = vmatprep.mubr.bf16.mxu1 %v3492_v58  ;;  %v6886_v58 = vld [vmem:[#allocation46_spill] sm:$0xff] }
 0x245   : > { %v3445_v30 = vadd.f32 %v6444_v7, %v3406_v17  ;;  %4719 = vmatmul.mubr.bf16.gmra.mrb[52].mxu1 %v3493_v55  ;;  %v3476_v23 = vmax.f32 %v3444_v19, 0.0  ;;  %v6885_v55 = vld [vmem:[#allocation48_spill] sm:$0xff] }
 0x246   : > { %v3443_v3 = vadd.f32 %v6444_v7, %v3404_v49  ;;  %v4680_v39 = vpop.f32.mrb[28].mxu0  ;;  %v3474_v41 = vmax.f32 %v3442_v0, 0.0  ;;  %v6887_v0 = vld [vmem:[#allocation50_spill] sm:$0xff] }
 0x247   : > { %v3477_v63 = vmax.f32 %v3445_v30, 0.0  ;;  %v4760_v61 = vadd.f32 %v4680_v39, %v6428_v35  ;;  %v3325_v62 = vpop.f32.mrb[29].mxu0 }
 0x248   : > { %v3475_v15 = vmax.f32 %v3443_v3, 0.0  ;;  %v4761_v14 = vadd.f32 %v3325_v62, %v6430_v2  ;;  %v4681_v60 = vpop.f32.mrb[30].mxu0  ;;  %v6888_v3 = vld [vmem:[#allocation47_spill] sm:$0xff]  ;;  %v6889_v62 = vld [vmem:[#allocation52_spill] sm:$0xff] }
 0x249   : > { %v3409_v25 = vmul.f32 %v4760_v61, %v6439_v53  ;;  %v4762_v34 = vadd.f32 %v4681_v60, %v6432_v40  ;;  %v3328_v46 = vpop.f32.mrb[31].mxu0  ;;  %v3495_v26 = vpack.c.bf16 %v3477_v63, %v3476_v23 }
 0x24a   : > { %v3407_v59 = vmul.f32 %v4761_v14, %v6439_v53  ;;  %v4763_v27 = vadd.f32 %v3328_v46, %v6434_v37  ;;  %v3494_v43 = vpack.c.bf16 %v3475_v15, %v3474_v41 }
 0x24b   : > { %v3448_v8 = vadd.f32 %v6444_v7, %v3409_v25  ;;  %v3410_v35 = vmul.f32 %v4762_v34, %v6439_v53  ;;  %v6890_v25 = vld [vmem:[#allocation53_spill] sm:$0xff] }
 0x24c   : > { %v3446_v45 = vadd.f32 %v6444_v7, %v3407_v59  ;;  %v3408_v2 = vmul.f32 %v4763_v27, %v6439_v53  ;;  %4722 = vmatprep.mubr.bf16.mxu1 %v3494_v43 }
 0x24d   : > { %v3449_v40 = vadd.f32 %v6444_v7, %v3410_v35  ;;  %4723 = vmatmul.mubr.bf16.gmra.mrb[56].mxu1 %v3495_v26  ;;  %v3480_v18 = vmax.f32 %v3448_v8, 0.0 }
 0x24e   : > { %v3447_v11 = vadd.f32 %v6444_v7, %v3408_v2  ;;  %v3478_v51 = vmax.f32 %v3446_v45, 0.0  ;;  %v5072_v7 = vld [vmem:[%s5579_s9 + $0x10] sm:$0xff] }
 0x24f   : > { %v3481_v37 = vmax.f32 %v3449_v40, 0.0 }
 0x250   : > { %v3479_v24 = vmax.f32 %v3447_v11, 0.0 }
 0x251   : > { %v3497_v36 = vpack.c.bf16 %v3481_v37, %v3480_v18 }
 0x252   : > { %v3496_v4 = vpack.c.bf16 %v3479_v24, %v3478_v51 }
 0x254   : > { %4726 = vmatprep.mubr.bf16.mxu1 %v3496_v4 }
 0x255   : > { %4727 = vmatmul.mubr.bf16.gmra.mrb[60].mxu1 %v3497_v36  ;;  %v6892_v36 = vld [vmem:[#allocation25_spill] sm:$0xff] }
 0x2f0   : > { %v4700_v53 = vpop.f32.mrb[32].mxu1 }
 0x2f1   : > { %v3725_v28 = vadd.f32 %v5072_v7, %v4700_v53  ;;  %v3596_v56 = vpop.f32.mrb[33].mxu1  ;;  %v6893_v53 = vld [vmem:[#allocation57_spill] sm:$0xff] }
 0x2f2   : > { %v3723_v31 = vadd.f32 %v5073_v1, %v3596_v56  ;;  %v4701_v9 = vpop.f32.mrb[34].mxu1 }
 0x2f3   : > { %3757 = vst.msk [vmem:[%s6539_s21 + $0x10] sm:$0xff] %vm732_vm4, %v3725_v28  ;;  %v3726_v47 = vadd.f32 %v4701_v9, %v6883_v21  ;;  %v3599_v52 = vpop.f32.mrb[35].mxu1 }
 0x2f4   : > { %3755 = vst.msk [vmem:[%s6539_s21] sm:$0xff] %vm732_vm4, %v3723_v31  ;;  %v3724_v6 = vadd.f32 %v3599_v52, %v6884_v48  ;;  %v6895_v31 = vld [vmem:[#allocation58_spill] sm:$0xff] }
 0x2f5   : > { %3758 = vst.msk [vmem:[%s6539_s21 + $0x18] sm:$0xff] %vm732_vm4, %v3726_v47  ;;  %v6896_v47 = vld [vmem:[#allocation32_spill] sm:$0xff] }
 0x2f6   : > { %3756 = vst.msk [vmem:[%s6539_s21 + $0x8] sm:$0xff] %vm732_vm4, %v3724_v6  ;;  %v6897_v6 = vld [vmem:[#allocation7_spill] sm:$0xff] }
 0x2f8   : > { %v4704_v42 = vpop.f32.mrb[36].mxu1 }
 0x2f9   : > { %v3729_v38 = vadd.f32 %v4704_v42, %v6885_v55  ;;  %v3612_v29 = vpop.f32.mrb[37].mxu1 }
 0x2fa   : > { %v3727_v19 = vadd.f32 %v3612_v29, %v6886_v58  ;;  %v4705_v17 = vpop.f32.mrb[38].mxu1 }
 0x2fb   : > { %3761 = vst.msk [vmem:[%s6539_s21 + $0x30] sm:$0xff] %vm732_vm4, %v3729_v38  ;;  %v3730_v49 = vadd.f32 %v4705_v17, %v6887_v0  ;;  %v3615_v30 = vpop.f32.mrb[39].mxu1  ;;  %v6898_v38 = vld [vmem:[#allocation8_spill] sm:$0xff] }
 0x2fc   : > { %3759 = vst.msk [vmem:[%s6539_s21 + $0x20] sm:$0xff] %vm732_vm4, %v3727_v19  ;;  %v3728_v39 = vadd.f32 %v3615_v30, %v6888_v3  ;;  %v6899_v19 = vld [vmem:[#allocation27_spill] sm:$0xff] }
 0x2fd   : > { %3762 = vst.msk [vmem:[%s6539_s21 + $0x38] sm:$0xff] %vm732_vm4, %v3730_v49 }
 0x2fe   : > { %3760 = vst.msk [vmem:[%s6539_s21 + $0x28] sm:$0xff] %vm732_vm4, %v3728_v39 }
 0x300   : > { %v4708_v23 = vpop.f32.mrb[40].mxu1 }
 0x301   : > { %v3733_v63 = vadd.f32 %v4708_v23, %v5804_v33  ;;  %v3628_v61 = vpop.f32.mrb[41].mxu1 }
 0x302   : > { %v3731_v41 = vadd.f32 %v3628_v61, %v6889_v62  ;;  %v4709_v15 = vpop.f32.mrb[42].mxu1 }
 0x303   : > { %3765 = vst.msk [vmem:[%s6539_s21 + $0x50] sm:$0xff] %vm732_vm4, %v3733_v63  ;;  %v3734_v14 = vadd.f32 %v4709_v15, %v5807_v54  ;;  %v3631_v60 = vpop.f32.mrb[43].mxu1 }
 0x304   : > { %3763 = vst.msk [vmem:[%s6539_s21 + $0x40] sm:$0xff] %vm732_vm4, %v3731_v41  ;;  %v3732_v34 = vadd.f32 %v3631_v60, %v6890_v25 }
 0x305   : > { %3766 = vst.msk [vmem:[%s6539_s21 + $0x58] sm:$0xff] %vm732_vm4, %v3734_v14 }
 0x306   : > { %3764 = vst.msk [vmem:[%s6539_s21 + $0x48] sm:$0xff] %vm732_vm4, %v3732_v34 }
 0x308   : > { %v4712_v33 = vpop.f32.mrb[44].mxu1 }
 0x309   : > { %v3737_v46 = vadd.f32 %v4712_v33, %v5874_v44  ;;  %v3644_v26 = vpop.f32.mrb[45].mxu1 }
 0x30a   : > { %v3735_v59 = vadd.f32 %v3644_v26, %v5811_v16  ;;  %v4713_v27 = vpop.f32.mrb[46].mxu1 }
 0x30b   : > { %3769 = vst.msk [vmem:[%s6539_s21 + $0x70] sm:$0xff] %vm732_vm4, %v3737_v46  ;;  %v3738_v54 = vadd.f32 %v4713_v27, %v5877_v22  ;;  %v3647_v43 = vpop.f32.mrb[47].mxu1 }
 0x30c   : > { %3767 = vst.msk [vmem:[%s6539_s21 + $0x60] sm:$0xff] %vm732_vm4, %v3735_v59  ;;  %v3736_v8 = vadd.f32 %v3647_v43, %v5814_v20 }
 0x30d   : > { %3770 = vst.msk [vmem:[%s6539_s21 + $0x78] sm:$0xff] %vm732_vm4, %v3738_v54 }
 0x30e   : > { %3768 = vst.msk [vmem:[%s6539_s21 + $0x68] sm:$0xff] %vm732_vm4, %v3736_v8 }
 0x310   : > { %v4716_v44 = vpop.f32.mrb[48].mxu1 }
 0x311   : > { %v3741_v16 = vadd.f32 %v4716_v44, %v5908_v13  ;;  %v3660_v35 = vpop.f32.mrb[49].mxu1 }
 0x312   : > { %v3739_v45 = vadd.f32 %v3660_v35, %v5880_v10  ;;  %v4717_v2 = vpop.f32.mrb[50].mxu1 }
 0x313   : > { %3773 = vst.msk [vmem:[%s6539_s21 + $0x90] sm:$0xff] %vm732_vm4, %v3741_v16  ;;  %v3742_v22 = vadd.f32 %v4717_v2, %v5911_v50  ;;  %v3663_v40 = vpop.f32.mrb[51].mxu1 }
 0x314   : > { %3771 = vst.msk [vmem:[%s6539_s21 + $0x80] sm:$0xff] %vm732_vm4, %v3739_v45  ;;  %v3740_v20 = vadd.f32 %v3663_v40, %v5883_v5  ;;  %v6891_v5 = vld [vmem:[#allocation56_spill] sm:$0xff] }
 0x315   : > { %3774 = vst.msk [vmem:[%s6539_s21 + $0x98] sm:$0xff] %vm732_vm4, %v3742_v22 }
 0x316   : > { %3772 = vst.msk [vmem:[%s6539_s21 + $0x88] sm:$0xff] %vm732_vm4, %v3740_v20 }
 0x318   : > { %v4720_v13 = vpop.f32.mrb[52].mxu1 }
 0x319   : > { %v3745_v10 = vadd.f32 %v4720_v13, %v5940_v12  ;;  %v3676_v11 = vpop.f32.mrb[53].mxu1 }
 0x31a   : > { %v3743_v18 = vadd.f32 %v3676_v11, %v5915_v32  ;;  %v4721_v37 = vpop.f32.mrb[54].mxu1 }
 0x31b   : > { %3777 = vst.msk [vmem:[%s6539_s21 + $0xb0] sm:$0xff] %vm732_vm4, %v3745_v10  ;;  %v3746_v50 = vadd.f32 %v4721_v37, %v5943_v57  ;;  %v3679_v51 = vpop.f32.mrb[55].mxu1  ;;  %v6894_v57 = vld [vmem:[#allocation6_spill] sm:$0xff] }
 0x31c   : > { %3775 = vst.msk [vmem:[%s6539_s21 + $0xa0] sm:$0xff] %vm732_vm4, %v3743_v18  ;;  %v3744_v24 = vadd.f32 %v3679_v51, %v6891_v5 }
 0x31d   : > { %3778 = vst.msk [vmem:[%s6539_s21 + $0xb8] sm:$0xff] %vm732_vm4, %v3746_v50 }
 0x31e   : > { %3776 = vst.msk [vmem:[%s6539_s21 + $0xa8] sm:$0xff] %vm732_vm4, %v3744_v24 }
 0x320   : > { %v4724_v12 = vpop.f32.mrb[56].mxu1 }
 0x321   : > { %v3749_v32 = vadd.f32 %v4724_v12, %v6892_v36  ;;  %v3692_v4 = vpop.f32.mrb[57].mxu1 }
 0x322   : > { %v3747_v7 = vadd.f32 %v3692_v4, %v6893_v53  ;;  %v4725_v28 = vpop.f32.mrb[58].mxu1 }
 0x323   : > { %3781 = vst.msk [vmem:[%s6539_s21 + $0xd0] sm:$0xff] %vm732_vm4, %v3749_v32  ;;  %v3750_v56 = vadd.f32 %v4725_v28, %v6894_v57  ;;  %v3695_v1 = vpop.f32.mrb[59].mxu1 }
 0x324   : > { %3779 = vst.msk [vmem:[%s6539_s21 + $0xc0] sm:$0xff] %vm732_vm4, %v3747_v7  ;;  %v3748_v9 = vadd.f32 %v3695_v1, %v6895_v31 }
 0x325   : > { %3782 = vst.msk [vmem:[%s6539_s21 + $0xd8] sm:$0xff] %vm732_vm4, %v3750_v56 }
 0x326   : > { %3780 = vst.msk [vmem:[%s6539_s21 + $0xc8] sm:$0xff] %vm732_vm4, %v3748_v9 }
 0x328   : > { %v4728_v21 = vpop.f32.mrb[60].mxu1 }
 0x329   : > { %v3753_v52 = vadd.f32 %v4728_v21, %v6896_v47  ;;  %v3708_v48 = vpop.f32.mrb[61].mxu1 }
 0x32a   : > { %v3751_v42 = vadd.f32 %v3708_v48, %v6897_v6  ;;  %v4729_v55 = vpop.f32.mrb[62].mxu1 }
 0x32b   : > { %3785 = vst.msk [vmem:[%s6539_s21 + $0xf0] sm:$0xff] %vm732_vm4, %v3753_v52  ;;  %v3754_v29 = vadd.f32 %v4729_v55, %v6898_v38  ;;  %v3711_v58 = vpop.f32.mrb[63].mxu1 }
 0x32c   : > { %3783 = vst.msk [vmem:[%s6539_s21 + $0xe0] sm:$0xff] %vm732_vm4, %v3751_v42  ;;  %v3752_v17 = vadd.f32 %v3711_v58, %v6899_v19 }
 0x32d   : > { %3786 = vst.msk [vmem:[%s6539_s21 + $0xf8] sm:$0xff] %vm732_vm4, %v3754_v29 }
 0x32e   : > { %3784 = vst.msk [vmem:[%s6539_s21 + $0xe8] sm:$0xff] %vm732_vm4, %v3752_v17 }
 0x32f PF: > { %s17_s24 = sadd.s32 1, %s5080_s24  }
 0x330   : > { %p14_p4 = scmp.ge.s32.totalorder %s17_s24, 4  }
 0x332   :  { %16 = sbr.rel (!%p14_p4) target bundleno = 1 (0x1), region = 89 }

</bundles_post_ra>
